<compile_context>
chip_gen: v6e
topology: v6e:2x2x1
jax: 0.10.0
libtpu: 0.0.40
codegen_flags: <defaults>
</compile_context>

<pallas_src>
import jax
import jax.numpy as jnp
import numpy as np
from jax import lax
from jax.experimental import pallas as pl
from jax.experimental.pallas import tpu as pltpu


# ---------------------------------------------------------------------------
# Small helpers
# ---------------------------------------------------------------------------

def _bytes(shape, dtype):
    return int(np.prod(shape)) * jnp.dtype(dtype).itemsize


def _compiler_params(semantics, est_block_bytes):
    # Size the scoped-VMEM limit from the resident blocks (+ buffering
    # headroom); clamp into a range that is safe on v5e/v6e (128 MiB phys)
    # and v7x (64 MiB phys).
    limit = int(min(max(3 * est_block_bytes + (8 << 20), 32 << 20), 60 << 20))
    return pltpu.CompilerParams(dimension_semantics=semantics,
                                vmem_limit_bytes=limit)


def _largest_divisor_leq(n, cap):
    for d in range(min(n, cap), 0, -1):
        if n % d == 0:
            return d
    return 1


def _row_tile(total, cap=256):
    if total <= cap:
        return total
    for d in range(cap - cap % 8, 7, -8):
        if total % d == 0:
            return d
    return total


def _col_tile(total, cap=2048):
    if total <= cap:
        return total
    for d in range(cap - cap % 128, 127, -128):
        if total % d == 0:
            return d
    return total


def _layernorm(y, eps=1e-5):
    mean = jnp.mean(y, axis=-1, keepdims=True)
    var = jnp.mean(jnp.square(y - mean), axis=-1, keepdims=True)
    return (y - mean) * lax.rsqrt(var + eps)


# ---------------------------------------------------------------------------
# Kernels
# ---------------------------------------------------------------------------

def _make_mha_kernel(n_heads, qkv_dim, masked):
    scale = 1.0 / float(np.sqrt(qkv_dim))

    def kernel(*refs):
        if masked:
            (q_ref, kv_ref, mask_ref, wq_ref, bq_ref, wk_ref, bk_ref,
             wv_ref, bv_ref, wo_ref, bo_ref, out_ref, attn_ref, ctx_sc) = refs
        else:
            (q_ref, kv_ref, wq_ref, bq_ref, wk_ref, bk_ref,
             wv_ref, bv_ref, wo_ref, bo_ref, out_ref, attn_ref, ctx_sc) = refs
            mask_ref = None

        nb, lq, dq = q_ref.shape
        lk = kv_ref.shape[1]
        hdk = n_heads * qkv_dim

        x = q_ref[...].astype(jnp.float32)                 # residual (f32)
        x2 = x.reshape(nb * lq, dq)
        kv2 = kv_ref[...].astype(jnp.float32).reshape(nb * lk, -1)

        xb = x2.astype(jnp.bfloat16)                       # MXU operands
        kvb = kv2.astype(jnp.bfloat16)

        # Fused Q/K/V projections over all NB items (bf16 in, f32 acc).
        qs = (jnp.dot(xb, wq_ref[...], preferred_element_type=jnp.float32)
              + bq_ref[...].astype(jnp.float32)).reshape(nb, lq, hdk)
        ks = (jnp.dot(kvb, wk_ref[...], preferred_element_type=jnp.float32)
              + bk_ref[...].astype(jnp.float32)).reshape(nb, lk, hdk)
        vs = (jnp.dot(kvb, wv_ref[...], preferred_element_type=jnp.float32)
              + bv_ref[...].astype(jnp.float32)).reshape(nb, lk, hdk)

        if masked:
            # mask is {0,1} float; turn into additive bias once (no per-head
            # compare+select).  masked_fill(-1e9) vs additive -1e9 differs
            # only far below the test tolerance.
            bias = mask_ref[...] * (-1e9)

        for h in range(n_heads):                            # static unroll
            lo = h * qkv_dim
            hi = lo + qkv_dim
            q_h = qs[:, :, lo:hi].astype(jnp.bfloat16)
            k_h = ks[:, :, lo:hi].astype(jnp.bfloat16)
            v_h = vs[:, :, lo:hi].astype(jnp.bfloat16)
            scores = jnp.einsum("bqd,bkd->bqk", q_h, k_h,
                                preferred_element_type=jnp.float32) * scale
            if masked:
                scores = scores + bias
            scores = scores - jnp.max(scores, axis=-1, keepdims=True)
            e = jnp.exp(scores)
            attn = e * pl.reciprocal(jnp.sum(e, axis=-1, keepdims=True),
                                     approx=True)
            attn_ref[:, h, :, :] = attn.astype(attn_ref.dtype)
            ctx = jnp.einsum("bqk,bkd->bqd", attn.astype(jnp.bfloat16), v_h,
                             preferred_element_type=jnp.float32)
            # Write this head's context into the concat buffer (bounds the
            # per-head live ranges; avoids keeping all heads in vregs).
            ctx_sc[:, lo:hi] = ctx.reshape(nb * lq, qkv_dim)

        # Single concat(heads) @ W_O matmul: full-depth MXU contraction.
        ctx_all = ctx_sc[...].astype(jnp.bfloat16)
        out = (jnp.dot(ctx_all, wo_ref[...],
                       preferred_element_type=jnp.float32)
               + bo_ref[...].astype(jnp.float32))
        y = _layernorm(out + x2)
        out_ref[...] = y.reshape(nb, lq, dq).astype(out_ref.dtype)

    return kernel


def _ffn_kernel(x_ref, w1_ref, b1_ref, w2_ref, b2_ref, out_ref):
    """Position-wise FFN (1x1 convs == linears) + residual + LayerNorm."""
    x = x_ref[...].astype(jnp.float32)
    h = (jnp.dot(x.astype(jnp.bfloat16), w1_ref[...],
                 preferred_element_type=jnp.float32)
         + b1_ref[...].astype(jnp.float32))
    h = jnp.maximum(h, 0.0)
    y = (jnp.dot(h.astype(jnp.bfloat16), w2_ref[...],
                 preferred_element_type=jnp.float32)
         + b2_ref[...].astype(jnp.float32))
    out_ref[...] = _layernorm(y + x).astype(out_ref.dtype)


def _proj_kernel(x_ref, w_ref, out_ref):
    out_ref[...] = jnp.dot(
        x_ref[...].astype(jnp.bfloat16), w_ref[...],
        preferred_element_type=jnp.float32).astype(out_ref.dtype)


# ---------------------------------------------------------------------------
# pallas_call wrappers
# ---------------------------------------------------------------------------

def _mha_forward(q_in, kv_in, mask, p, *, n_heads, qkv_dim):
    """mask=None means 'no masking' (dec-enc attention): mask input dropped."""
    B, Lq, Dq = q_in.shape
    _, Lk, Dk = kv_in.shape
    hdk = n_heads * qkv_dim
    masked = mask is not None
    nb = _largest_divisor_leq(B, 4)          # batch items per grid step
    grid = (B // nb,)

    kernel = _make_mha_kernel(n_heads, qkv_dim, masked)
    batched3 = lambda b: (b, 0, 0)
    const2 = lambda b: (0, 0)

    in_specs = [pl.BlockSpec((nb, Lq, Dq), batched3),
                pl.BlockSpec((nb, Lk, Dk), batched3)]
    operands = [q_in, kv_in]
    if masked:
        in_specs.append(pl.BlockSpec((nb, Lq, Lk), batched3))
        operands.append(mask)
    in_specs += [
        pl.BlockSpec((Dq, hdk), const2),     # W_Q (VMEM resident)
        pl.BlockSpec((1, hdk), const2),      # b_Q
        pl.BlockSpec((Dk, hdk), const2),     # W_K
        pl.BlockSpec((1, hdk), const2),      # b_K
        pl.BlockSpec((Dk, hdk), const2),     # W_V
        pl.BlockSpec((1, hdk), const2),      # b_V
        pl.BlockSpec((hdk, Dq), const2),     # W_O
        pl.BlockSpec((1, Dq), const2),       # b_O
    ]
    operands += [p["wq"], p["bq"], p["wk"], p["bk"], p["wv"], p["bv"],
                 p["wo"], p["bo"]]

    est = (_bytes((nb, Lq, Dq), jnp.float32) * 2          # q block + out block
           + _bytes((nb, Lk, Dk), kv_in.dtype)
           + (_bytes((nb, Lq, Lk), jnp.float32) if masked else 0)
           + _bytes((nb, n_heads, Lq, Lk), jnp.bfloat16)
           + _bytes((Dq + 2 * Dk + hdk, hdk), jnp.bfloat16)   # weights
           + _bytes((nb * Lq, hdk), jnp.float32))             # scratch

    out, attn = pl.pallas_call(
        kernel,
        out_shape=(jax.ShapeDtypeStruct((B, Lq, Dq), jnp.float32),
                   jax.ShapeDtypeStruct((B, n_heads, Lq, Lk), jnp.bfloat16)),
        grid=grid,
        in_specs=in_specs,
        out_specs=(pl.BlockSpec((nb, Lq, Dq), batched3),
                   pl.BlockSpec((nb, n_heads, Lq, Lk),
                                lambda b: (b, 0, 0, 0))),
        scratch_shapes=[pltpu.VMEM((nb * Lq, hdk), jnp.float32)],
        compiler_params=_compiler_params(("parallel",), est),
    )(*operands)
    return out, attn


def _ffn_forward(x2, p):
    """x2: (B*L, D) flattened rows."""
    R, D = x2.shape
    d_ff = p["w1"].shape[1]
    tm = _row_tile(R)
    grid = (R // tm,)
    est = (_bytes((tm, D), jnp.float32) * 2
           + _bytes((D, d_ff), jnp.bfloat16) * 2
           + _bytes((tm, d_ff), jnp.float32))
    return pl.pallas_call(
        _ffn_kernel,
        out_shape=jax.ShapeDtypeStruct((R, D), jnp.float32),
        grid=grid,
        in_specs=[
            pl.BlockSpec((tm, D), lambda i: (i, 0)),
            pl.BlockSpec((D, d_ff), lambda i: (0, 0)),
            pl.BlockSpec((1, d_ff), lambda i: (0, 0)),
            pl.BlockSpec((d_ff, D), lambda i: (0, 0)),
            pl.BlockSpec((1, D), lambda i: (0, 0)),
        ],
        out_specs=pl.BlockSpec((tm, D), lambda i: (i, 0)),
        compiler_params=_compiler_params(("parallel",), est),
    )(x2, p["w1"], p["b1"], p["w2"], p["b2"])


def _projection_forward(x2, w):
    """x2: (B*L, D) flattened rows; w: (D, V) bf16.  Tiled over (rows, vocab)."""
    R, D = x2.shape
    V = w.shape[1]
    tm = _row_tile(R)
    tv = _col_tile(V)
    grid = (R // tm, V // tv)
    est = (_bytes((tm, D), jnp.float32) + _bytes((D, tv), jnp.bfloat16)
           + _bytes((tm, tv), jnp.float32))
    return pl.pallas_call(
        _proj_kernel,
        out_shape=jax.ShapeDtypeStruct((R, V), jnp.float32),
        grid=grid,
        in_specs=[
            pl.BlockSpec((tm, D), lambda i, j: (i, 0)),
            pl.BlockSpec((D, tv), lambda i, j: (0, j)),
        ],
        out_specs=pl.BlockSpec((tm, tv), lambda i, j: (i, j)),
        compiler_params=_compiler_params(("parallel", "parallel"), est),
    )(x2, w)


# ---------------------------------------------------------------------------
# Decoder forward (mirrors Decoder.forward, eval mode)
# ---------------------------------------------------------------------------

def decoder_forward(encoder_out, encoded_captions, caption_lengths, params, *,
                    n_heads, qkv_dim, attention_method="ByPixel"):
    B, n_ctx, _ = encoder_out.shape
    L = encoded_captions.shape[1]

    # Sort by decreasing caption length (torch .sort(descending=True)).
    lengths = caption_lengths.reshape(B)
    sort_ind = jnp.argsort(-lengths)
    lengths_sorted = lengths[sort_ind]
    encoder_out = encoder_out[sort_ind]
    encoded_captions = encoded_captions[sort_ind]
    decode_lengths = lengths_sorted - 1

    # Token + positional embedding (data-dependent gather: plain JAX glue).
    dec = (jnp.take(params["tgt_emb"], encoded_captions, axis=0)
           + params["pos_emb"][None, :L, :]).astype(jnp.float32)
    # TODO(synk): self.dropout is identity in eval mode.

    # Self-attn mask as float {0,1}; 1 == masked (matches masked_fill_(-1e9)).
    pad = (encoded_captions == 0)[:, None, :]
    causal = jnp.triu(jnp.ones((L, L), dtype=bool), k=1)[None, :, :]
    self_mask = jnp.logical_or(jnp.broadcast_to(pad, (B, L, L)),
                               causal).astype(jnp.float32)
    # 'ByPixel' / 'ByChannel': dec-enc mask is all-False -> masked=False path
    # (no mask tensor is built or read at all).

    dec_self_attns, dec_enc_attns = [], []
    for layer in params["layers"]:
        dec, a_self = _mha_forward(dec, dec, self_mask, layer["self_attn"],
                                   n_heads=n_heads, qkv_dim=qkv_dim)
        dec, a_enc = _mha_forward(dec, encoder_out, None, layer["enc_attn"],
                                  n_heads=n_heads, qkv_dim=qkv_dim)
        D = dec.shape[-1]
        dec = _ffn_forward(dec.reshape(B * L, D),
                           layer["ffn"]).reshape(B, L, D)
        dec_self_attns.append(a_self)
        dec_enc_attns.append(a_enc)

    D = dec.shape[-1]
    predictions = _projection_forward(dec.reshape(B * L, D),
                                      params["projection"]).reshape(B, L, -1)
    return (predictions, encoded_captions, decode_lengths, sort_ind,
            dec_self_attns, dec_enc_attns)


# ---------------------------------------------------------------------------
# Parameter construction (weights stored as (in, out), i.e. transposed torch;
# matmul weights in bf16, biases / embeddings in f32)
# ---------------------------------------------------------------------------

def _position_embedding_table(max_len, embed_dim):
    def cal_angle(position, hid_idx):
        return position / np.power(10000, 2 * (hid_idx // 2) / embed_dim)
    table = np.array([[cal_angle(p, i) for i in range(embed_dim)]
                      for p in range(max_len)], dtype=np.float64)
    table[:, 0::2] = np.sin(table[:, 0::2])
    table[:, 1::2] = np.cos(table[:, 1::2])
    return table.astype(np.float32)


def init_decoder_params(key, *, vocab_size, embed_dim, enc_dim, d_ff,
                        n_layers, n_heads, qkv_dim, max_len):
    hdk = n_heads * qkv_dim
    keys = iter(jax.random.split(key, 2 + n_layers * 20))

    def dense(shape, dtype, scale=0.05):
        return (scale * jax.random.normal(next(keys), shape,
                                          jnp.float32)).astype(dtype)

    tgt_emb = 0.1 * jax.random.normal(next(keys), (vocab_size, embed_dim),
                                      jnp.float32)
    tgt_emb = tgt_emb.at[0].set(0.0)          # nn.Embedding(padding_idx=0)
    pos_emb = jnp.asarray(_position_embedding_table(max_len, embed_dim))

    layers = []
    for _ in range(n_layers):
        def attn_params(k_dim):
            return {"wq": dense((embed_dim, hdk), jnp.bfloat16),
                    "bq": dense((1, hdk), jnp.float32),
                    "wk": dense((k_dim, hdk), jnp.bfloat16),
                    "bk": dense((1, hdk), jnp.float32),
                    "wv": dense((k_dim, hdk), jnp.bfloat16),
                    "bv": dense((1, hdk), jnp.float32),
                    "wo": dense((hdk, embed_dim), jnp.bfloat16),
                    "bo": dense((1, embed_dim), jnp.float32)}
        layers.append({
            "self_attn": attn_params(embed_dim),
            "enc_attn": attn_params(enc_dim),
            "ffn": {"w1": dense((embed_dim, d_ff), jnp.bfloat16),
                    "b1": dense((1, d_ff), jnp.float32),
                    "w2": dense((d_ff, embed_dim), jnp.bfloat16),
                    "b2": dense((1, embed_dim), jnp.float32)},
        })
    projection = dense((embed_dim, vocab_size), jnp.bfloat16)
    return {"tgt_emb": tgt_emb, "pos_emb": pos_emb, "layers": layers,
            "projection": projection}


# ---------------------------------------------------------------------------
# Pure-numpy float64 reference (mirrors the PyTorch forward, eval mode)
# ---------------------------------------------------------------------------

def _to_f64(x):
    return np.asarray(jax.device_get(x)).astype(np.float64)


def _np_f32(x):
    return np.asarray(jax.device_get(x)).astype(np.float32)


def _ref_layernorm(x, eps=1e-5):
    m = x.mean(-1, keepdims=True)
    v = ((x - m) ** 2).mean(-1, keepdims=True)
    return (x - m) / np.sqrt(v + eps)


def _ref_mha(q, kv, mask, p, n_heads, dk):
    qs = q @ p["wq"] + p["bq"]
    ks = kv @ p["wk"] + p["bk"]
    vs = kv @ p["wv"] + p["bv"]
    B, Lq, _ = qs.shape
    Lk = ks.shape[1]
    qs = qs.reshape(B, Lq, n_heads, dk).transpose(0, 2, 1, 3)
    ks = ks.reshape(B, Lk, n_heads, dk).transpose(0, 2, 1, 3)
    vs = vs.reshape(B, Lk, n_heads, dk).transpose(0, 2, 1, 3)
    scores = np.matmul(qs, ks.transpose(0, 1, 3, 2)) / np.sqrt(dk)
    scores = np.where(mask[:, None, :, :] > 0.5, -1e9, scores)
    scores = scores - scores.max(-1, keepdims=True)
    e = np.exp(scores)
    attn = e / e.sum(-1, keepdims=True)
    ctx = np.matmul(attn, vs).transpose(0, 2, 1, 3).reshape(B, Lq, n_heads * dk)
    out = ctx @ p["wo"] + p["bo"]
    return _ref_layernorm(out + q), attn


def _reference_decoder(encoder_out, encoded_captions, caption_lengths, params,
                       n_heads, qkv_dim):
    enc = _to_f64(encoder_out)
    caps = np.asarray(encoded_captions)
    lens = np.asarray(caption_lengths).reshape(-1)
    sort_ind = np.argsort(-lens)
    enc, caps, lens_sorted = enc[sort_ind], caps[sort_ind], lens[sort_ind]
    B, L = caps.shape

    tgt = _to_f64(params["tgt_emb"])
    pos = _to_f64(params["pos_emb"])
    dec = tgt[caps] + pos[np.arange(L)][None]

    pad = (caps == 0)[:, None, :]
    causal = np.triu(np.ones((L, L)), k=1).astype(bool)[None]
    self_mask = (np.broadcast_to(pad, (B, L, L)) | causal).astype(np.float64)
    enc_mask = np.zeros((B, L, enc.shape[1]), np.float64)

    self_attns, enc_attns = [], []
    for layer in params["layers"]:
        p = {k: _to_f64(v) for k, v in layer["self_attn"].items()}
        dec, a1 = _ref_mha(dec, dec, self_mask, p, n_heads, qkv_dim)
        p = {k: _to_f64(v) for k, v in layer["enc_attn"].items()}
        dec, a2 = _ref_mha(dec, enc, enc_mask, p, n_heads, qkv_dim)
        p = {k: _to_f64(v) for k, v in layer["ffn"].items()}
        h = np.maximum(dec @ p["w1"] + p["b1"], 0.0)
        y = h @ p["w2"] + p["b2"]
        dec = _ref_layernorm(y + dec)
        self_attns.append(a1)
        enc_attns.append(a2)

    preds = dec @ _to_f64(params["projection"])
    return preds, caps, lens_sorted - 1, sort_ind, self_attns, enc_attns


# ---------------------------------------------------------------------------

if __name__ == "__main__":
    key = jax.random.PRNGKey(0)
    # Small, TPU-tile-friendly shapes consistent with the module
    # (real model: max_len=52, embed=512, heads=8, QKVdim=64,
    #  encoder (196, 2048), d_ff=2048, vocab ~10k).
    B, L, n_ctx = 2, 16, 32
    embed_dim, enc_dim, d_ff = 128, 256, 256
    vocab_size, n_layers, n_heads, qkv_dim = 128, 2, 4, 32

    k_params, k_enc, k_caps = jax.random.split(key, 3)
    params = init_decoder_params(
        k_params, vocab_size=vocab_size, embed_dim=embed_dim, enc_dim=enc_dim,
        d_ff=d_ff, n_layers=n_layers, n_heads=n_heads, qkv_dim=qkv_dim,
        max_len=L)

    encoder_out = jax.random.normal(k_enc, (B, n_ctx, enc_dim), jnp.float32)
    caption_lengths = jnp.array([[9], [12]], dtype=jnp.int32)
    raw_caps = jax.random.randint(k_caps, (B, L), 1, vocab_size,
                                  dtype=jnp.int32)
    encoded_captions = jnp.where(jnp.arange(L)[None, :] < caption_lengths,
                                 raw_caps, 0)

    outs = decoder_forward(encoder_out, encoded_captions, caption_lengths,
                           params, n_heads=n_heads, qkv_dim=qkv_dim,
                           attention_method="ByPixel")
    preds, caps_sorted, decode_lengths, sort_ind, self_attns, enc_attns = outs
    preds = jax.block_until_ready(preds)

    assert preds.shape == (B, L, vocab_size), preds.shape
    assert self_attns[0].shape == (B, n_heads, L, L)
    assert enc_attns[0].shape == (B, n_heads, L, n_ctx)

    ref = _reference_decoder(encoder_out, encoded_captions, caption_lengths,
                             params, n_heads, qkv_dim)
    np.testing.assert_array_equal(np.asarray(sort_ind), ref[3])
    np.testing.assert_array_equal(np.asarray(caps_sorted), ref[1])
    np.testing.assert_array_equal(np.asarray(decode_lengths), ref[2])
    np.testing.assert_allclose(np.asarray(preds), ref[0], rtol=3e-2, atol=3e-2)
    np.testing.assert_allclose(_np_f32(self_attns[-1]), ref[4][-1],
                               rtol=3e-2, atol=3e-2)
    np.testing.assert_allclose(_np_f32(enc_attns[-1]), ref[5][-1],
                               rtol=3e-2, atol=3e-2)

    print("KERNEL_OK")
</pallas_src>

<mosaic_0001>
module attributes {stable_mosaic.version = 11 : i64} {
  func.func @kernel(%arg0: i32, %arg1: memref<2x16x128xf32, #tpu.memory_space<vmem>>, %arg2: memref<2x16x128xf32, #tpu.memory_space<vmem>>, %arg3: memref<2x16x16xf32, #tpu.memory_space<vmem>>, %arg4: memref<128x128xbf16, #tpu.memory_space<vmem>>, %arg5: memref<1x128xf32, #tpu.memory_space<vmem>>, %arg6: memref<128x128xbf16, #tpu.memory_space<vmem>>, %arg7: memref<1x128xf32, #tpu.memory_space<vmem>>, %arg8: memref<128x128xbf16, #tpu.memory_space<vmem>>, %arg9: memref<1x128xf32, #tpu.memory_space<vmem>>, %arg10: memref<128x128xbf16, #tpu.memory_space<vmem>>, %arg11: memref<1x128xf32, #tpu.memory_space<vmem>>, %arg12: memref<2x16x128xf32, #tpu.memory_space<vmem>>, %arg13: memref<2x4x16x16xbf16, #tpu.memory_space<vmem>>, %arg14: memref<32x128xf32, #tpu.memory_space<vmem>>) attributes {dimension_semantics = [#tpu.dimension_semantics<parallel>], iteration_bounds = array<i64: 1>, scalar_prefetch = 0 : i64, scratch_operands = 1 : i64, tpu.core_type = #tpu.core_type<tc>, window_params = [{transform_indices = @transform_0, window_bounds = array<i64: 2, 16, 128>}, {transform_indices = @transform_1, window_bounds = array<i64: 2, 16, 128>}, {transform_indices = @transform_2, window_bounds = array<i64: 2, 16, 16>}, {pipeline_mode = #tpu.pipeline_mode<synchronous>, transform_indices = @transform_3, window_bounds = array<i64: 128, 128>}, {pipeline_mode = #tpu.pipeline_mode<synchronous>, transform_indices = @transform_4, window_bounds = array<i64: 1, 128>}, {pipeline_mode = #tpu.pipeline_mode<synchronous>, transform_indices = @transform_5, window_bounds = array<i64: 128, 128>}, {pipeline_mode = #tpu.pipeline_mode<synchronous>, transform_indices = @transform_6, window_bounds = array<i64: 1, 128>}, {pipeline_mode = #tpu.pipeline_mode<synchronous>, transform_indices = @transform_7, window_bounds = array<i64: 128, 128>}, {pipeline_mode = #tpu.pipeline_mode<synchronous>, transform_indices = @transform_8, window_bounds = array<i64: 1, 128>}, {pipeline_mode = #tpu.pipeline_mode<synchronous>, transform_indices = @transform_9, window_bounds = array<i64: 128, 128>}, {pipeline_mode = #tpu.pipeline_mode<synchronous>, transform_indices = @transform_10, window_bounds = array<i64: 1, 128>}, {transform_indices = @transform_11, window_bounds = array<i64: 2, 16, 128>}, {transform_indices = @transform_12, window_bounds = array<i64: 2, 4, 16, 16>}]} {
    %c0 = arith.constant 0 : index
    %c0_0 = arith.constant 0 : index
    %c0_1 = arith.constant 0 : index
    %0 = vector.load %arg1[%c0, %c0_0, %c0_1] : memref<2x16x128xf32, #tpu.memory_space<vmem>>, vector<2x16x128xf32>
    %1 = vector.shape_cast %0 : vector<2x16x128xf32> to vector<32x128xf32>
    %c0_2 = arith.constant 0 : index
    %c0_3 = arith.constant 0 : index
    %c0_4 = arith.constant 0 : index
    %2 = vector.load %arg2[%c0_2, %c0_3, %c0_4] : memref<2x16x128xf32, #tpu.memory_space<vmem>>, vector<2x16x128xf32>
    %3 = vector.shape_cast %2 : vector<2x16x128xf32> to vector<32x128xf32>
    %4 = arith.truncf %1 : vector<32x128xf32> to vector<32x128xbf16>
    %5 = arith.truncf %3 : vector<32x128xf32> to vector<32x128xbf16>
    %c0_5 = arith.constant 0 : index
    %c0_6 = arith.constant 0 : index
    %6 = vector.load %arg4[%c0_5, %c0_6] : memref<128x128xbf16, #tpu.memory_space<vmem>>, vector<128x128xbf16>
    %cst = arith.constant dense<0.000000e+00> : vector<32x128xf32>
    %7 = tpu.matmul %4, %6, %cst {dimension_numbers = #tpu.dot_dimension_numbers<[1], [0], [0], [1], [0, 0, 1, 1], [], []>} : vector<32x128xbf16>, vector<128x128xbf16>, vector<32x128xf32> -> vector<32x128xf32>
    %c0_7 = arith.constant 0 : index
    %c0_8 = arith.constant 0 : index
    %8 = vector.load %arg5[%c0_7, %c0_8] : memref<1x128xf32, #tpu.memory_space<vmem>>, vector<1x128xf32>
    %9 = vector.broadcast %8 : vector<1x128xf32> to vector<32x128xf32>
    %10 = arith.addf %7, %9 : vector<32x128xf32>
    %11 = vector.shape_cast %10 : vector<32x128xf32> to vector<2x16x128xf32>
    %c0_9 = arith.constant 0 : index
    %c0_10 = arith.constant 0 : index
    %12 = vector.load %arg6[%c0_9, %c0_10] : memref<128x128xbf16, #tpu.memory_space<vmem>>, vector<128x128xbf16>
    %cst_11 = arith.constant dense<0.000000e+00> : vector<32x128xf32>
    %13 = tpu.matmul %5, %12, %cst_11 {dimension_numbers = #tpu.dot_dimension_numbers<[1], [0], [0], [1], [0, 0, 1, 1], [], []>} : vector<32x128xbf16>, vector<128x128xbf16>, vector<32x128xf32> -> vector<32x128xf32>
    %c0_12 = arith.constant 0 : index
    %c0_13 = arith.constant 0 : index
    %14 = vector.load %arg7[%c0_12, %c0_13] : memref<1x128xf32, #tpu.memory_space<vmem>>, vector<1x128xf32>
    %15 = vector.broadcast %14 : vector<1x128xf32> to vector<32x128xf32>
    %16 = arith.addf %13, %15 : vector<32x128xf32>
    %17 = vector.shape_cast %16 : vector<32x128xf32> to vector<2x16x128xf32>
    %c0_14 = arith.constant 0 : index
    %c0_15 = arith.constant 0 : index
    %18 = vector.load %arg8[%c0_14, %c0_15] : memref<128x128xbf16, #tpu.memory_space<vmem>>, vector<128x128xbf16>
    %cst_16 = arith.constant dense<0.000000e+00> : vector<32x128xf32>
    %19 = tpu.matmul %5, %18, %cst_16 {dimension_numbers = #tpu.dot_dimension_numbers<[1], [0], [0], [1], [0, 0, 1, 1], [], []>} : vector<32x128xbf16>, vector<128x128xbf16>, vector<32x128xf32> -> vector<32x128xf32>
    %c0_17 = arith.constant 0 : index
    %c0_18 = arith.constant 0 : index
    %20 = vector.load %arg9[%c0_17, %c0_18] : memref<1x128xf32, #tpu.memory_space<vmem>>, vector<1x128xf32>
    %21 = vector.broadcast %20 : vector<1x128xf32> to vector<32x128xf32>
    %22 = arith.addf %19, %21 : vector<32x128xf32>
    %23 = vector.shape_cast %22 : vector<32x128xf32> to vector<2x16x128xf32>
    %c0_19 = arith.constant 0 : index
    %c0_20 = arith.constant 0 : index
    %c0_21 = arith.constant 0 : index
    %24 = vector.load %arg3[%c0_19, %c0_20, %c0_21] : memref<2x16x16xf32, #tpu.memory_space<vmem>>, vector<2x16x16xf32>
    %cst_22 = arith.constant -1.000000e+09 : f32
    %25 = vector.broadcast %cst_22 : f32 to vector<2x16x16xf32>
    %26 = arith.mulf %24, %25 : vector<2x16x16xf32>
    %27 = vector.extract_strided_slice %11 {offsets = [0, 0, 0], sizes = [2, 16, 32], strides = [1, 1, 1]} : vector<2x16x128xf32> to vector<2x16x32xf32>
    %28 = arith.truncf %27 : vector<2x16x32xf32> to vector<2x16x32xbf16>
    %29 = vector.extract_strided_slice %17 {offsets = [0, 0, 0], sizes = [2, 16, 32], strides = [1, 1, 1]} : vector<2x16x128xf32> to vector<2x16x32xf32>
    %30 = arith.truncf %29 : vector<2x16x32xf32> to vector<2x16x32xbf16>
    %31 = vector.extract_strided_slice %23 {offsets = [0, 0, 0], sizes = [2, 16, 32], strides = [1, 1, 1]} : vector<2x16x128xf32> to vector<2x16x32xf32>
    %32 = arith.truncf %31 : vector<2x16x32xf32> to vector<2x16x32xbf16>
    "tpu.trace_start"() <{level = 10 : i32, message = "bqd,bkd->bqk"}> : () -> ()
    %cst_23 = arith.constant dense<0.000000e+00> : vector<2x16x16xf32>
    %33 = tpu.matmul %28, %30, %cst_23 {dimension_numbers = #tpu.dot_dimension_numbers<[2], [2], [1], [1], [0, 0, 0, 1, 1, 1], [0], [0]>} : vector<2x16x32xbf16>, vector<2x16x32xbf16>, vector<2x16x16xf32> -> vector<2x16x16xf32>
    "tpu.trace_stop"() : () -> ()
    %cst_24 = arith.constant 0.176776692 : f32
    %34 = vector.broadcast %cst_24 : f32 to vector<2x16x16xf32>
    %35 = arith.mulf %33, %34 : vector<2x16x16xf32>
    %36 = arith.addf %35, %26 : vector<2x16x16xf32>
    %cst_25 = arith.constant dense<0xFF800000> : vector<2x16xf32>
    %37 = vector.multi_reduction <maximumf>, %36, %cst_25 [2] : vector<2x16x16xf32> to vector<2x16xf32>
    %38 = vector.shape_cast %37 : vector<2x16xf32> to vector<2x16x1xf32>
    %39 = vector.broadcast %38 : vector<2x16x1xf32> to vector<2x16x16xf32>
    %40 = arith.subf %36, %39 : vector<2x16x16xf32>
    %41 = math.exp %40 : vector<2x16x16xf32>
    %cst_26 = arith.constant dense<0.000000e+00> : vector<2x16xf32>
    %42 = vector.multi_reduction <add>, %41, %cst_26 [2] : vector<2x16x16xf32> to vector<2x16xf32>
    %43 = vector.shape_cast %42 : vector<2x16xf32> to vector<2x16x1xf32>
    %44 = tpu.reciprocal %43 {approx = true} : vector<2x16x1xf32> -> vector<2x16x1xf32>
    %45 = vector.broadcast %44 : vector<2x16x1xf32> to vector<2x16x16xf32>
    %46 = arith.mulf %41, %45 : vector<2x16x16xf32>
    %47 = arith.truncf %46 : vector<2x16x16xf32> to vector<2x16x16xbf16>
    %c0_27 = arith.constant 0 : index
    %c0_28 = arith.constant 0 : index
    %c0_29 = arith.constant 0 : index
    %c0_30 = arith.constant 0 : index
    %48 = vector.load %arg13[%c0_27, %c0_28, %c0_29, %c0_30] : memref<2x4x16x16xbf16, #tpu.memory_space<vmem>>, vector<2x1x16x16xbf16>
    %49 = vector.shape_cast %48 : vector<2x1x16x16xbf16> to vector<2x16x16xbf16>
    %50 = vector.shape_cast %47 : vector<2x16x16xbf16> to vector<2x1x16x16xbf16>
    tpu.vector_store %arg13[%c0_27, %c0_28, %c0_29, %c0_30], %50 {strides = array<i32>} : memref<2x4x16x16xbf16, #tpu.memory_space<vmem>>, vector<2x1x16x16xbf16>,
    %51 = arith.truncf %46 : vector<2x16x16xf32> to vector<2x16x16xbf16>
    "tpu.trace_start"() <{level = 10 : i32, message = "bqk,bkd->bqd"}> : () -> ()
    %cst_31 = arith.constant dense<0.000000e+00> : vector<2x16x32xf32>
    %52 = tpu.matmul %51, %32, %cst_31 {dimension_numbers = #tpu.dot_dimension_numbers<[2], [1], [1], [2], [0, 0, 0, 1, 1, 2], [0], [0]>} : vector<2x16x16xbf16>, vector<2x16x32xbf16>, vector<2x16x32xf32> -> vector<2x16x32xf32>
    "tpu.trace_stop"() : () -> ()
    %53 = vector.shape_cast %52 : vector<2x16x32xf32> to vector<32x32xf32>
    %c0_32 = arith.constant 0 : index
    %c0_33 = arith.constant 0 : index
    %54 = vector.load %arg14[%c0_32, %c0_33] : memref<32x128xf32, #tpu.memory_space<vmem>>, vector<32x32xf32>
    tpu.vector_store %arg14[%c0_32, %c0_33], %53 {strides = array<i32>} : memref<32x128xf32, #tpu.memory_space<vmem>>, vector<32x32xf32>,
    %55 = vector.extract_strided_slice %11 {offsets = [0, 0, 32], sizes = [2, 16, 32], strides = [1, 1, 1]} : vector<2x16x128xf32> to vector<2x16x32xf32>
    %56 = arith.truncf %55 : vector<2x16x32xf32> to vector<2x16x32xbf16>
    %57 = vector.extract_strided_slice %17 {offsets = [0, 0, 32], sizes = [2, 16, 32], strides = [1, 1, 1]} : vector<2x16x128xf32> to vector<2x16x32xf32>
    %58 = arith.truncf %57 : vector<2x16x32xf32> to vector<2x16x32xbf16>
    %59 = vector.extract_strided_slice %23 {offsets = [0, 0, 32], sizes = [2, 16, 32], strides = [1, 1, 1]} : vector<2x16x128xf32> to vector<2x16x32xf32>
    %60 = arith.truncf %59 : vector<2x16x32xf32> to vector<2x16x32xbf16>
    "tpu.trace_start"() <{level = 10 : i32, message = "bqd,bkd->bqk"}> : () -> ()
    %cst_34 = arith.constant dense<0.000000e+00> : vector<2x16x16xf32>
    %61 = tpu.matmul %56, %58, %cst_34 {dimension_numbers = #tpu.dot_dimension_numbers<[2], [2], [1], [1], [0, 0, 0, 1, 1, 1], [0], [0]>} : vector<2x16x32xbf16>, vector<2x16x32xbf16>, vector<2x16x16xf32> -> vector<2x16x16xf32>
    "tpu.trace_stop"() : () -> ()
    %cst_35 = arith.constant 0.176776692 : f32
    %62 = vector.broadcast %cst_35 : f32 to vector<2x16x16xf32>
    %63 = arith.mulf %61, %62 : vector<2x16x16xf32>
    %64 = arith.addf %63, %26 : vector<2x16x16xf32>
    %cst_36 = arith.constant dense<0xFF800000> : vector<2x16xf32>
    %65 = vector.multi_reduction <maximumf>, %64, %cst_36 [2] : vector<2x16x16xf32> to vector<2x16xf32>
    %66 = vector.shape_cast %65 : vector<2x16xf32> to vector<2x16x1xf32>
    %67 = vector.broadcast %66 : vector<2x16x1xf32> to vector<2x16x16xf32>
    %68 = arith.subf %64, %67 : vector<2x16x16xf32>
    %69 = math.exp %68 : vector<2x16x16xf32>
    %cst_37 = arith.constant dense<0.000000e+00> : vector<2x16xf32>
    %70 = vector.multi_reduction <add>, %69, %cst_37 [2] : vector<2x16x16xf32> to vector<2x16xf32>
    %71 = vector.shape_cast %70 : vector<2x16xf32> to vector<2x16x1xf32>
    %72 = tpu.reciprocal %71 {approx = true} : vector<2x16x1xf32> -> vector<2x16x1xf32>
    %73 = vector.broadcast %72 : vector<2x16x1xf32> to vector<2x16x16xf32>
    %74 = arith.mulf %69, %73 : vector<2x16x16xf32>
    %75 = arith.truncf %74 : vector<2x16x16xf32> to vector<2x16x16xbf16>
    %c0_38 = arith.constant 0 : index
    %c1 = arith.constant 1 : index
    %c0_39 = arith.constant 0 : index
    %c0_40 = arith.constant 0 : index
    %76 = vector.load %arg13[%c0_38, %c1, %c0_39, %c0_40] : memref<2x4x16x16xbf16, #tpu.memory_space<vmem>>, vector<2x1x16x16xbf16>
    %77 = vector.shape_cast %76 : vector<2x1x16x16xbf16> to vector<2x16x16xbf16>
    %78 = vector.shape_cast %75 : vector<2x16x16xbf16> to vector<2x1x16x16xbf16>
    tpu.vector_store %arg13[%c0_38, %c1, %c0_39, %c0_40], %78 {strides = array<i32>} : memref<2x4x16x16xbf16, #tpu.memory_space<vmem>>, vector<2x1x16x16xbf16>,
    %79 = arith.truncf %74 : vector<2x16x16xf32> to vector<2x16x16xbf16>
    "tpu.trace_start"() <{level = 10 : i32, message = "bqk,bkd->bqd"}> : () -> ()
    %cst_41 = arith.constant dense<0.000000e+00> : vector<2x16x32xf32>
    %80 = tpu.matmul %79, %60, %cst_41 {dimension_numbers = #tpu.dot_dimension_numbers<[2], [1], [1], [2], [0, 0, 0, 1, 1, 2], [0], [0]>} : vector<2x16x16xbf16>, vector<2x16x32xbf16>, vector<2x16x32xf32> -> vector<2x16x32xf32>
    "tpu.trace_stop"() : () -> ()
    %81 = vector.shape_cast %80 : vector<2x16x32xf32> to vector<32x32xf32>
    %c0_42 = arith.constant 0 : index
    %c32 = arith.constant 32 : index
    %82 = vector.load %arg14[%c0_42, %c32] : memref<32x128xf32, #tpu.memory_space<vmem>>, vector<32x32xf32>
    tpu.vector_store %arg14[%c0_42, %c32], %81 {strides = array<i32>} : memref<32x128xf32, #tpu.memory_space<vmem>>, vector<32x32xf32>,
    %83 = vector.extract_strided_slice %11 {offsets = [0, 0, 64], sizes = [2, 16, 32], strides = [1, 1, 1]} : vector<2x16x128xf32> to vector<2x16x32xf32>
    %84 = arith.truncf %83 : vector<2x16x32xf32> to vector<2x16x32xbf16>
    %85 = vector.extract_strided_slice %17 {offsets = [0, 0, 64], sizes = [2, 16, 32], strides = [1, 1, 1]} : vector<2x16x128xf32> to vector<2x16x32xf32>
    %86 = arith.truncf %85 : vector<2x16x32xf32> to vector<2x16x32xbf16>
    %87 = vector.extract_strided_slice %23 {offsets = [0, 0, 64], sizes = [2, 16, 32], strides = [1, 1, 1]} : vector<2x16x128xf32> to vector<2x16x32xf32>
    %88 = arith.truncf %87 : vector<2x16x32xf32> to vector<2x16x32xbf16>
    "tpu.trace_start"() <{level = 10 : i32, message = "bqd,bkd->bqk"}> : () -> ()
    %cst_43 = arith.constant dense<0.000000e+00> : vector<2x16x16xf32>
    %89 = tpu.matmul %84, %86, %cst_43 {dimension_numbers = #tpu.dot_dimension_numbers<[2], [2], [1], [1], [0, 0, 0, 1, 1, 1], [0], [0]>} : vector<2x16x32xbf16>, vector<2x16x32xbf16>, vector<2x16x16xf32> -> vector<2x16x16xf32>
    "tpu.trace_stop"() : () -> ()
    %cst_44 = arith.constant 0.176776692 : f32
    %90 = vector.broadcast %cst_44 : f32 to vector<2x16x16xf32>
    %91 = arith.mulf %89, %90 : vector<2x16x16xf32>
    %92 = arith.addf %91, %26 : vector<2x16x16xf32>
    %cst_45 = arith.constant dense<0xFF800000> : vector<2x16xf32>
    %93 = vector.multi_reduction <maximumf>, %92, %cst_45 [2] : vector<2x16x16xf32> to vector<2x16xf32>
    %94 = vector.shape_cast %93 : vector<2x16xf32> to vector<2x16x1xf32>
    %95 = vector.broadcast %94 : vector<2x16x1xf32> to vector<2x16x16xf32>
    %96 = arith.subf %92, %95 : vector<2x16x16xf32>
    %97 = math.exp %96 : vector<2x16x16xf32>
    %cst_46 = arith.constant dense<0.000000e+00> : vector<2x16xf32>
    %98 = vector.multi_reduction <add>, %97, %cst_46 [2] : vector<2x16x16xf32> to vector<2x16xf32>
    %99 = vector.shape_cast %98 : vector<2x16xf32> to vector<2x16x1xf32>
    %100 = tpu.reciprocal %99 {approx = true} : vector<2x16x1xf32> -> vector<2x16x1xf32>
    %101 = vector.broadcast %100 : vector<2x16x1xf32> to vector<2x16x16xf32>
    %102 = arith.mulf %97, %101 : vector<2x16x16xf32>
    %103 = arith.truncf %102 : vector<2x16x16xf32> to vector<2x16x16xbf16>
    %c0_47 = arith.constant 0 : index
    %c2 = arith.constant 2 : index
    %c0_48 = arith.constant 0 : index
    %c0_49 = arith.constant 0 : index
    %104 = vector.load %arg13[%c0_47, %c2, %c0_48, %c0_49] : memref<2x4x16x16xbf16, #tpu.memory_space<vmem>>, vector<2x1x16x16xbf16>
    %105 = vector.shape_cast %104 : vector<2x1x16x16xbf16> to vector<2x16x16xbf16>
    %106 = vector.shape_cast %103 : vector<2x16x16xbf16> to vector<2x1x16x16xbf16>
    tpu.vector_store %arg13[%c0_47, %c2, %c0_48, %c0_49], %106 {strides = array<i32>} : memref<2x4x16x16xbf16, #tpu.memory_space<vmem>>, vector<2x1x16x16xbf16>,
    %107 = arith.truncf %102 : vector<2x16x16xf32> to vector<2x16x16xbf16>
    "tpu.trace_start"() <{level = 10 : i32, message = "bqk,bkd->bqd"}> : () -> ()
    %cst_50 = arith.constant dense<0.000000e+00> : vector<2x16x32xf32>
    %108 = tpu.matmul %107, %88, %cst_50 {dimension_numbers = #tpu.dot_dimension_numbers<[2], [1], [1], [2], [0, 0, 0, 1, 1, 2], [0], [0]>} : vector<2x16x16xbf16>, vector<2x16x32xbf16>, vector<2x16x32xf32> -> vector<2x16x32xf32>
    "tpu.trace_stop"() : () -> ()
    %109 = vector.shape_cast %108 : vector<2x16x32xf32> to vector<32x32xf32>
    %c0_51 = arith.constant 0 : index
    %c64 = arith.constant 64 : index
    %110 = vector.load %arg14[%c0_51, %c64] : memref<32x128xf32, #tpu.memory_space<vmem>>, vector<32x32xf32>
    tpu.vector_store %arg14[%c0_51, %c64], %109 {strides = array<i32>} : memref<32x128xf32, #tpu.memory_space<vmem>>, vector<32x32xf32>,
    %111 = vector.extract_strided_slice %11 {offsets = [0, 0, 96], sizes = [2, 16, 32], strides = [1, 1, 1]} : vector<2x16x128xf32> to vector<2x16x32xf32>
    %112 = arith.truncf %111 : vector<2x16x32xf32> to vector<2x16x32xbf16>
    %113 = vector.extract_strided_slice %17 {offsets = [0, 0, 96], sizes = [2, 16, 32], strides = [1, 1, 1]} : vector<2x16x128xf32> to vector<2x16x32xf32>
    %114 = arith.truncf %113 : vector<2x16x32xf32> to vector<2x16x32xbf16>
    %115 = vector.extract_strided_slice %23 {offsets = [0, 0, 96], sizes = [2, 16, 32], strides = [1, 1, 1]} : vector<2x16x128xf32> to vector<2x16x32xf32>
    %116 = arith.truncf %115 : vector<2x16x32xf32> to vector<2x16x32xbf16>
    "tpu.trace_start"() <{level = 10 : i32, message = "bqd,bkd->bqk"}> : () -> ()
    %cst_52 = arith.constant dense<0.000000e+00> : vector<2x16x16xf32>
    %117 = tpu.matmul %112, %114, %cst_52 {dimension_numbers = #tpu.dot_dimension_numbers<[2], [2], [1], [1], [0, 0, 0, 1, 1, 1], [0], [0]>} : vector<2x16x32xbf16>, vector<2x16x32xbf16>, vector<2x16x16xf32> -> vector<2x16x16xf32>
    "tpu.trace_stop"() : () -> ()
    %cst_53 = arith.constant 0.176776692 : f32
    %118 = vector.broadcast %cst_53 : f32 to vector<2x16x16xf32>
    %119 = arith.mulf %117, %118 : vector<2x16x16xf32>
    %120 = arith.addf %119, %26 : vector<2x16x16xf32>
    %cst_54 = arith.constant dense<0xFF800000> : vector<2x16xf32>
    %121 = vector.multi_reduction <maximumf>, %120, %cst_54 [2] : vector<2x16x16xf32> to vector<2x16xf32>
    %122 = vector.shape_cast %121 : vector<2x16xf32> to vector<2x16x1xf32>
    %123 = vector.broadcast %122 : vector<2x16x1xf32> to vector<2x16x16xf32>
    %124 = arith.subf %120, %123 : vector<2x16x16xf32>
    %125 = math.exp %124 : vector<2x16x16xf32>
    %cst_55 = arith.constant dense<0.000000e+00> : vector<2x16xf32>
    %126 = vector.multi_reduction <add>, %125, %cst_55 [2] : vector<2x16x16xf32> to vector<2x16xf32>
    %127 = vector.shape_cast %126 : vector<2x16xf32> to vector<2x16x1xf32>
    %128 = tpu.reciprocal %127 {approx = true} : vector<2x16x1xf32> -> vector<2x16x1xf32>
    %129 = vector.broadcast %128 : vector<2x16x1xf32> to vector<2x16x16xf32>
    %130 = arith.mulf %125, %129 : vector<2x16x16xf32>
    %131 = arith.truncf %130 : vector<2x16x16xf32> to vector<2x16x16xbf16>
    %c0_56 = arith.constant 0 : index
    %c3 = arith.constant 3 : index
    %c0_57 = arith.constant 0 : index
    %c0_58 = arith.constant 0 : index
    %132 = vector.load %arg13[%c0_56, %c3, %c0_57, %c0_58] : memref<2x4x16x16xbf16, #tpu.memory_space<vmem>>, vector<2x1x16x16xbf16>
    %133 = vector.shape_cast %132 : vector<2x1x16x16xbf16> to vector<2x16x16xbf16>
    %134 = vector.shape_cast %131 : vector<2x16x16xbf16> to vector<2x1x16x16xbf16>
    tpu.vector_store %arg13[%c0_56, %c3, %c0_57, %c0_58], %134 {strides = array<i32>} : memref<2x4x16x16xbf16, #tpu.memory_space<vmem>>, vector<2x1x16x16xbf16>,
    %135 = arith.truncf %130 : vector<2x16x16xf32> to vector<2x16x16xbf16>
    "tpu.trace_start"() <{level = 10 : i32, message = "bqk,bkd->bqd"}> : () -> ()
    %cst_59 = arith.constant dense<0.000000e+00> : vector<2x16x32xf32>
    %136 = tpu.matmul %135, %116, %cst_59 {dimension_numbers = #tpu.dot_dimension_numbers<[2], [1], [1], [2], [0, 0, 0, 1, 1, 2], [0], [0]>} : vector<2x16x16xbf16>, vector<2x16x32xbf16>, vector<2x16x32xf32> -> vector<2x16x32xf32>
    "tpu.trace_stop"() : () -> ()
    %137 = vector.shape_cast %136 : vector<2x16x32xf32> to vector<32x32xf32>
    %c0_60 = arith.constant 0 : index
    %c96 = arith.constant 96 : index
    %138 = vector.load %arg14[%c0_60, %c96] : memref<32x128xf32, #tpu.memory_space<vmem>>, vector<32x32xf32>
    tpu.vector_store %arg14[%c0_60, %c96], %137 {strides = array<i32>} : memref<32x128xf32, #tpu.memory_space<vmem>>, vector<32x32xf32>,
    %c0_61 = arith.constant 0 : index
    %c0_62 = arith.constant 0 : index
    %139 = vector.load %arg14[%c0_61, %c0_62] : memref<32x128xf32, #tpu.memory_space<vmem>>, vector<32x128xf32>
    %140 = arith.truncf %139 : vector<32x128xf32> to vector<32x128xbf16>
    %c0_63 = arith.constant 0 : index
    %c0_64 = arith.constant 0 : index
    %141 = vector.load %arg10[%c0_63, %c0_64] : memref<128x128xbf16, #tpu.memory_space<vmem>>, vector<128x128xbf16>
    %cst_65 = arith.constant dense<0.000000e+00> : vector<32x128xf32>
    %142 = tpu.matmul %140, %141, %cst_65 {dimension_numbers = #tpu.dot_dimension_numbers<[1], [0], [0], [1], [0, 0, 1, 1], [], []>} : vector<32x128xbf16>, vector<128x128xbf16>, vector<32x128xf32> -> vector<32x128xf32>
    %c0_66 = arith.constant 0 : index
    %c0_67 = arith.constant 0 : index
    %143 = vector.load %arg11[%c0_66, %c0_67] : memref<1x128xf32, #tpu.memory_space<vmem>>, vector<1x128xf32>
    %144 = vector.broadcast %143 : vector<1x128xf32> to vector<32x128xf32>
    %145 = arith.addf %142, %144 : vector<32x128xf32>
    %146 = arith.addf %145, %1 : vector<32x128xf32>
    %cst_68 = arith.constant dense<0.000000e+00> : vector<32xf32>
    %147 = vector.multi_reduction <add>, %146, %cst_68 [1] : vector<32x128xf32> to vector<32xf32>
    %148 = vector.shape_cast %147 : vector<32xf32> to vector<32x1xf32>
    %cst_69 = arith.constant 1.280000e+02 : f32
    %149 = vector.broadcast %cst_69 : f32 to vector<32x1xf32>
    %150 = arith.divf %148, %149 : vector<32x1xf32>
    %151 = vector.broadcast %150 : vector<32x1xf32> to vector<32x128xf32>
    %152 = arith.subf %146, %151 : vector<32x128xf32>
    %153 = arith.mulf %152, %152 : vector<32x128xf32>
    %cst_70 = arith.constant dense<0.000000e+00> : vector<32xf32>
    %154 = vector.multi_reduction <add>, %153, %cst_70 [1] : vector<32x128xf32> to vector<32xf32>
    %155 = vector.shape_cast %154 : vector<32xf32> to vector<32x1xf32>
    %cst_71 = arith.constant 1.280000e+02 : f32
    %156 = vector.broadcast %cst_71 : f32 to vector<32x1xf32>
    %157 = arith.divf %155, %156 : vector<32x1xf32>
    %158 = vector.broadcast %150 : vector<32x1xf32> to vector<32x128xf32>
    %159 = arith.subf %146, %158 : vector<32x128xf32>
    %cst_72 = arith.constant 9.99999974E-6 : f32
    %160 = vector.broadcast %cst_72 : f32 to vector<32x1xf32>
    %161 = arith.addf %157, %160 : vector<32x1xf32>
    %162 = math.rsqrt %161 : vector<32x1xf32>
    %163 = vector.broadcast %162 : vector<32x1xf32> to vector<32x128xf32>
    %164 = arith.mulf %159, %163 : vector<32x128xf32>
    %165 = vector.shape_cast %164 : vector<32x128xf32> to vector<2x16x128xf32>
    %c0_73 = arith.constant 0 : index
    %c0_74 = arith.constant 0 : index
    %c0_75 = arith.constant 0 : index
    %166 = vector.load %arg12[%c0_73, %c0_74, %c0_75] : memref<2x16x128xf32, #tpu.memory_space<vmem>>, vector<2x16x128xf32>
    tpu.vector_store %arg12[%c0_73, %c0_74, %c0_75], %165 {strides = array<i32>} : memref<2x16x128xf32, #tpu.memory_space<vmem>>, vector<2x16x128xf32>,
    return
  }
  func.func @transform_0(%arg0: i32) -> (i32, i32, i32) {
    %c0_i32 = arith.constant 0 : i32
    %c0_i32_0 = arith.constant 0 : i32
    %c0_i32_1 = arith.constant 0 : i32
    return %arg0, %c0_i32, %c0_i32_0 : i32, i32, i32
  }
  func.func @transform_1(%arg0: i32) -> (i32, i32, i32) {
    %c0_i32 = arith.constant 0 : i32
    %c0_i32_0 = arith.constant 0 : i32
    %c0_i32_1 = arith.constant 0 : i32
    return %arg0, %c0_i32, %c0_i32_0 : i32, i32, i32
  }
  func.func @transform_2(%arg0: i32) -> (i32, i32, i32) {
    %c0_i32 = arith.constant 0 : i32
    %c0_i32_0 = arith.constant 0 : i32
    %c0_i32_1 = arith.constant 0 : i32
    return %arg0, %c0_i32, %c0_i32_0 : i32, i32, i32
  }
  func.func @transform_3(%arg0: i32) -> (i32, i32) {
    %c0_i32 = arith.constant 0 : i32
    %c0_i32_0 = arith.constant 0 : i32
    %c0_i32_1 = arith.constant 0 : i32
    return %c0_i32, %c0_i32_0 : i32, i32
  }
  func.func @transform_4(%arg0: i32) -> (i32, i32) {
    %c0_i32 = arith.constant 0 : i32
    %c0_i32_0 = arith.constant 0 : i32
    %c0_i32_1 = arith.constant 0 : i32
    return %c0_i32, %c0_i32_0 : i32, i32
  }
  func.func @transform_5(%arg0: i32) -> (i32, i32) {
    %c0_i32 = arith.constant 0 : i32
    %c0_i32_0 = arith.constant 0 : i32
    %c0_i32_1 = arith.constant 0 : i32
    return %c0_i32, %c0_i32_0 : i32, i32
  }
  func.func @transform_6(%arg0: i32) -> (i32, i32) {
    %c0_i32 = arith.constant 0 : i32
    %c0_i32_0 = arith.constant 0 : i32
    %c0_i32_1 = arith.constant 0 : i32
    return %c0_i32, %c0_i32_0 : i32, i32
  }
  func.func @transform_7(%arg0: i32) -> (i32, i32) {
    %c0_i32 = arith.constant 0 : i32
    %c0_i32_0 = arith.constant 0 : i32
    %c0_i32_1 = arith.constant 0 : i32
    return %c0_i32, %c0_i32_0 : i32, i32
  }
  func.func @transform_8(%arg0: i32) -> (i32, i32) {
    %c0_i32 = arith.constant 0 : i32
    %c0_i32_0 = arith.constant 0 : i32
    %c0_i32_1 = arith.constant 0 : i32
    return %c0_i32, %c0_i32_0 : i32, i32
  }
  func.func @transform_9(%arg0: i32) -> (i32, i32) {
    %c0_i32 = arith.constant 0 : i32
    %c0_i32_0 = arith.constant 0 : i32
    %c0_i32_1 = arith.constant 0 : i32
    return %c0_i32, %c0_i32_0 : i32, i32
  }
  func.func @transform_10(%arg0: i32) -> (i32, i32) {
    %c0_i32 = arith.constant 0 : i32
    %c0_i32_0 = arith.constant 0 : i32
    %c0_i32_1 = arith.constant 0 : i32
    return %c0_i32, %c0_i32_0 : i32, i32
  }
  func.func @transform_11(%arg0: i32) -> (i32, i32, i32) {
    %c0_i32 = arith.constant 0 : i32
    %c0_i32_0 = arith.constant 0 : i32
    %c0_i32_1 = arith.constant 0 : i32
    return %arg0, %c0_i32, %c0_i32_0 : i32, i32, i32
  }
  func.func @transform_12(%arg0: i32) -> (i32, i32, i32, i32) {
    %c0_i32 = arith.constant 0 : i32
    %c0_i32_0 = arith.constant 0 : i32
    %c0_i32_1 = arith.constant 0 : i32
    %c0_i32_2 = arith.constant 0 : i32
    return %arg0, %c0_i32, %c0_i32_0, %c0_i32_1 : i32, i32, i32, i32
  }
}

</mosaic_0001>

<bundles_post_ra>
// kernel: tpu_custom_call.1
= control target key start
LH: loop header
LB: loop body
LE: loop exit
PB: predicated region body
PF: predicated region fallthrough
CT: control target
= control target key end

     0   :  { %18 = vsyncpa [#allocation4], 0  ;;  %s2917_s0 = inlined_call_operand.hbm [shape: f32[2,16,128], index: 0, kind: input, shape index: {}]   ;;  %s2918_s1 = inlined_call_operand.hbm [shape: f32[2,16,128], index: 1, kind: input, shape index: {}]   ;;  %s2919_s2 = inlined_call_operand.hbm [shape: f32[2,16,16], index: 2, kind: input, shape index: {}]   ;;  %s2920_s3 = inlined_call_operand.hbm [shape: bf16[128,128], index: 3, kind: input, shape index: {}]   ;;  %s2921_s4 = inlined_call_operand.vmem [shape: f32[1,128], index: 4, kind: input, shape index: {}]   ;;  %s2922_s5 = inlined_call_operand.hbm [shape: bf16[128,128], index: 5, kind: input, shape index: {}]   ;;  %s2923_s6 = inlined_call_operand.vmem [shape: f32[1,128], index: 6, kind: input, shape index: {}]   ;;  %s2924_s7 = inlined_call_operand.hbm [shape: bf16[128,128], index: 7, kind: input, shape index: {}]   ;;  %s2925_s8 = inlined_call_operand.vmem [shape: f32[1,128], index: 8, kind: input, shape index: {}]   ;;  %s2926_s9 = inlined_call_operand.hbm [shape: bf16[128,128], index: 9, kind: input, shape index: {}]   ;;  %s2927_s10 = inlined_call_operand.vmem [shape: f32[1,128], index: 10, kind: input, shape index: {}]   ;;  %s2928_s11 = inlined_call_operand.hbm [shape: f32[2,16,128], index: 11, kind: output, shape index: {0}]   ;;  %s2929_s12 = inlined_call_operand.hbm [shape: bf16[2,4,16,16], index: 12, kind: output, shape index: {1}]  }
   0x1   :  { %19 = vsyncpa [#allocation7], 0 }
   0x2   :  { %20 = vsyncpa [#allocation10], 0 }
   0x3   :  { %21 = vsyncpa [#allocation13], 0 }
   0x4   :  { %22 = vsyncpa [#allocation5], 0 }
   0x5   :  { %23 = vsyncpa [#allocation17], 0  ;;  %s2525_s21 = smov [#allocation6]   ;;  %s2526_s23 = smov [#allocation9]  }
   0x6   :  { %s41_s22 = sshll.u32 %s2525_s21, 4  ;;  %s65_s24 = sshll.u32 %s2526_s23, 4  ;;  %s42_s22 = int_to_ptr.vmem [resolvable:$true] %s41_s22  ;;  %s66_s24 = int_to_ptr.vmem [resolvable:$true] %s65_s24 }
   0x7   :  { %s2341_s25 = scalar_lea.vmem %s42_s22, 512  ;;  %p2346_p1 = scmp.lt.s32.totalorder %s42_s22, %s42_s22 }
   0x8   :  { %p2342_p0 = scmp.ne.s32.totalorder %s42_s22, %s2341_s25  ;;  %p2347_p2 = scmp.lt.s32.totalorder %s2341_s25, %s2341_s25 }
   0xa   :  { %p2348_p3 = por %p2347_p2, %p2346_p1 }
   0xc   :  { %p2349_p4 = pnand %p2348_p3, %p2342_p0 }
   0xe   :  { %2352 = shalt.err (!%p2349_p4)
}
   0xf   :  { %s2527_s26 = smov 128   ;;  %s2528_s27 = smov 8  }
  0x10   :  { %47 = dma.hbm_to_vmem [thread:$0]  %s2918_s1, 512, %s42_s22, [#allocation7], %s2527_s26, %s2527_s26, %s2528_s27  }
  0x11   :  { %s2361_s30 = scalar_lea.vmem %s66_s24, 1024  ;;  %p2366_p6 = scmp.lt.s32.totalorder %s66_s24, %s66_s24 }
  0x12   :  { %p2362_p5 = scmp.ne.s32.totalorder %s66_s24, %s2361_s30  ;;  %p2367_p7 = scmp.lt.s32.totalorder %s2361_s30, %s2361_s30 }
  0x14   :  { %p2368_p8 = por %p2367_p7, %p2366_p6 }
  0x16   :  { %p2369_p9 = pnand %p2368_p8, %p2362_p5 }
  0x18   :  { %2372 = shalt.err (!%p2369_p9)
}
  0x19   :  { %s2529_s13 = smov 64   ;;  %s2530_s14 = smov 4  }
  0x1a   :  { %71 = dma.hbm_to_vmem [thread:$0]  %s2920_s3, 1024, %s66_s24, [#allocation10], %s2529_s13, %s2529_s13, %s2530_s14  }
  0x1b   :  { %s2531_s17 = smov [#allocation12]   ;;  %s2532_s19 = smov [#allocation3]  }
  0x1c   :  { %s93_s18 = sshll.u32 %s2531_s17, 4  ;;  %s29_s1 = sshll.u32 %s2532_s19, 4  ;;  %s94_s18 = int_to_ptr.vmem [resolvable:$true] %s93_s18  ;;  %s30_s1 = int_to_ptr.vmem [resolvable:$true] %s29_s1 }
  0x1d   :  { %s2381_s20 = scalar_lea.vmem %s94_s18, 1024  ;;  %p2386_p11 = scmp.lt.s32.totalorder %s94_s18, %s94_s18 }
  0x1e   :  { %p2382_p10 = scmp.ne.s32.totalorder %s94_s18, %s2381_s20  ;;  %p2387_p12 = scmp.lt.s32.totalorder %s2381_s20, %s2381_s20 }
  0x20   :  { %p2388_p13 = por %p2387_p12, %p2386_p11 }
  0x22   :  { %p2389_p0 = pnand %p2388_p13, %p2382_p10 }
  0x24   :  { %2392 = shalt.err (!%p2389_p0)
}
  0x25   :  { %99 = dma.hbm_to_vmem [thread:$0]  %s2924_s7, 1024, %s94_s18, [#allocation13], %s2529_s13, %s2529_s13, %s2530_s14  }
  0x26   :  { %s2401_s3 = scalar_lea.vmem %s30_s1, 512  ;;  %p2406_p2 = scmp.lt.s32.totalorder %s30_s1, %s30_s1 }
  0x27   :  { %p2402_p1 = scmp.ne.s32.totalorder %s30_s1, %s2401_s3  ;;  %p2407_p3 = scmp.lt.s32.totalorder %s2401_s3, %s2401_s3 }
  0x29   :  { %p2408_p4 = por %p2407_p3, %p2406_p2 }
  0x2b   :  { %p2409_p5 = pnand %p2408_p4, %p2402_p1 }
  0x2d   :  { %2412 = shalt.err (!%p2409_p5)
}
  0x2e   :  { %35 = dma.hbm_to_vmem [thread:$0]  %s2917_s0, 512, %s30_s1, [#allocation4], %s2527_s26, %s2527_s26, %s2528_s27  }
  0x2f   :  { %s2533_s25 = smov [#allocation8]   ;;  %s2534_s29 = smov [#allocation11]  }
  0x30   :  { %s53_s28 = sshll.u32 %s2533_s25, 4  ;;  %s79_s30 = sshll.u32 %s2534_s29, 4  ;;  %s54_s28 = int_to_ptr.vmem [resolvable:$true] %s53_s28  ;;  %s80_s30 = int_to_ptr.vmem [resolvable:$true] %s79_s30 }
  0x31   :  { %s2421_s7 = scalar_lea.vmem %s54_s28, 512  ;;  %p2426_p7 = scmp.lt.s32.totalorder %s54_s28, %s54_s28 }
  0x32   :  { %p2422_p6 = scmp.ne.s32.totalorder %s54_s28, %s2421_s7  ;;  %p2427_p8 = scmp.lt.s32.totalorder %s2421_s7, %s2421_s7 }
  0x34   :  { %p2428_p9 = por %p2427_p8, %p2426_p7 }
  0x36   :  { %p2429_p10 = pnand %p2428_p9, %p2422_p6 }
  0x38   :  { %2432 = shalt.err (!%p2429_p10)
}
  0x39   :  { %59 = dma.hbm_to_vmem [thread:$0]  %s2919_s2, 512, %s54_s28, [#allocation7], %s2527_s26, %s2527_s26, %s2528_s27  }
  0x3a   :  { %s2441_s0 = scalar_lea.vmem %s80_s30, 1024  ;;  %p2446_p12 = scmp.lt.s32.totalorder %s80_s30, %s80_s30 }
  0x3b   :  { %p2442_p11 = scmp.ne.s32.totalorder %s80_s30, %s2441_s0  ;;  %p2447_p13 = scmp.lt.s32.totalorder %s2441_s0, %s2441_s0 }
  0x3d   :  { %p2448_p0 = por %p2447_p13, %p2446_p12 }
  0x3f   :  { %p2449_p1 = pnand %p2448_p0, %p2442_p11 }
  0x41   :  { %2452 = shalt.err (!%p2449_p1)
}
  0x42   :  { %85 = dma.hbm_to_vmem [thread:$0]  %s2922_s5, 1024, %s80_s30, [#allocation10], %s2529_s13, %s2529_s13, %s2530_s14  }
  0x43   :  { %s2535_s19 = smov [#allocation14]  }
  0x44   :  { %s107_s1 = sshll.u32 %s2535_s19, 4  ;;  %s108_s1 = int_to_ptr.vmem [resolvable:$true] %s107_s1 }
  0x45   :  { %s2461_s20 = scalar_lea.vmem %s108_s1, 1024  ;;  %p2466_p3 = scmp.lt.s32.totalorder %s108_s1, %s108_s1 }
  0x46   :  { %p2462_p2 = scmp.ne.s32.totalorder %s108_s1, %s2461_s20  ;;  %p2467_p4 = scmp.lt.s32.totalorder %s2461_s20, %s2461_s20 }
  0x48   :  { %p2468_p5 = por %p2467_p4, %p2466_p3 }
  0x4a   :  { %p2469_p6 = pnand %p2468_p5, %p2462_p2 }
  0x4c   :  { %2472 = shalt.err (!%p2469_p6)
}
  0x4d   :  { %113 = dma.hbm_to_vmem [thread:$0]  %s2926_s9, 1024, %s108_s1, [#allocation13], %s2529_s13, %s2529_s13, %s2530_s14  }
  0x4e   :  { %2513 = dma.done.wait [#allocation4], 512  }
  0x4f   :  { %2514 = vsyncadd [#allocation4], 4294966784 }
  0x50   :  { %2515 = dma.done.wait [#allocation7], 1024  }
  0x51   :  { %2516 = vsyncadd [#allocation7], 4294966272 }
  0x52   :  { %2517 = dma.done.wait [#allocation10], 2048  }
  0x53   :  { %2518 = vsyncadd [#allocation10], 4294965248 }
  0x54   :  { %2519 = dma.done.wait [#allocation13], 2048  }
  0x55   :  { %2520 = vsyncadd [#allocation13], 4294965248  ;;  %v2225_v0 = vld [vmem:[#allocation11 + $0x38] sm:$0xff]   ;;  %v2227_v2 = vld [vmem:[#allocation11 + $0x30] sm:$0xff]   ;;  %v2536_v28 = vmov 0.0   ;;  %vm2537_vm0 = vmmov 0  }
  0x56   :  { %v2226_v1 = vld [vmem:[#allocation9 + $0x38] sm:$0xff]   ;;  %2052 = vmatprep.subr.bf16.mxu1 %v2225_v0  ;;  %v2228_v3 = vld [vmem:[#allocation9 + $0x30] sm:$0xff]   ;;  %v2229_v4 = vld [vmem:[#allocation11 + $0x28] sm:$0xff]   ;;  %vm524_vm1 = vcmask 261120   ;;  %vm627_vm2 = vcmask 130048   ;;  %vm688_vm3 = vcmask 125952  }
  0x57   :  { %2053 = vmatpush3.bf16.msra.mxu1 %v2225_v0  ;;  %2032 = vmatprep.subr.bf16.mxu0 %v2226_v1  ;;  %v2230_v5 = vld [vmem:[#allocation9 + $0x28] sm:$0xff]   ;;  %v2231_v6 = vld [vmem:[#allocation11 + $0x20] sm:$0xff]   ;;  %v2233_v8 = vld [vmem:[#allocation11 + $0x18] sm:$0xff]   ;;  %s2539_s23 = smov 32   ;;  %vm1076_vm4 = vcmask 523520   ;;  %vm1366_vm5 = vcmask 785920  }
  0x58   :  { %2033 = vmatpush3.bf16.msra.mxu0 %v2226_v1  ;;  %2054 = vmatprep.subr.bf16.mxu1 %v2227_v2  ;;  %v2232_v7 = vld [vmem:[#allocation9 + $0x20] sm:$0xff]   ;;  %v2234_v9 = vld [vmem:[#allocation9 + $0x18] sm:$0xff]   ;;  %v2235_v10 = vld [vmem:[#allocation11 + $0x10] sm:$0xff]   ;;  %vm1656_vm6 = vcmask 1048320  }
  0x59   :  { %2034 = vmatprep.subr.bf16.mxu0 %v2228_v3  ;;  %v142_v11 = vld [vmem:[#allocation6] sm:$0xff]  ;;  %v143_v12 = vld [vmem:[#allocation6 + $0x8] sm:$0xff]  ;;  %v2236_v13 = vld [vmem:[#allocation9 + $0x10] sm:$0xff]  }
  0x5a   :  { %v148_v14 = vpack.c.bf16 %v143_v12, %v142_v11  ;;  %v138_v15 = vld [vmem:[#allocation3] sm:$0xff]  ;;  %v139_v16 = vld [vmem:[#allocation3 + $0x8] sm:$0xff]  ;;  %v144_v22 = vld [vmem:[#allocation6 + $0x10] sm:$0xff] }
  0x5b   :  { %2055 = vmatpush3.bf16.msra.mxu1 %v2227_v2  ;;  %v2237_v17 = vld [vmem:[#allocation11 + $0x8] sm:$0xff]   ;;  %v146_v18 = vpack.c.bf16 %v139_v16, %v138_v15  ;;  %v2239_v20 = vld [vmem:[#allocation11] sm:$0xff]   ;;  %v145_v23 = vld [vmem:[#allocation6 + $0x18] sm:$0xff] }
  0x5c   :  { %2035 = vmatpush3.bf16.msra.mxu0 %v2228_v3  ;;  %2056 = vmatprep.subr.bf16.mxu1 %v2229_v4  ;;  %v2238_v19 = vld [vmem:[#allocation9 + $0x8] sm:$0xff]   ;;  %v2240_v21 = vld [vmem:[#allocation9] sm:$0xff]   ;;  %v140_v24 = vld [vmem:[#allocation3 + $0x10] sm:$0xff]  ;;  %v2649_v26 = vpack.c.bf16 %v145_v23, %v144_v22 }
  0x5d   :  { %2036 = vmatprep.subr.bf16.mxu0 %v2230_v5  ;;  %2068 = vmatprep.mubr.bf16.mxu1 %v148_v14  ;;  %v141_v25 = vld [vmem:[#allocation3 + $0x18] sm:$0xff]  ;;  %v1885_v34 = vld [vmem:[%s2923_s6] ss:$0 sm:$0xff]  ;;  %v2242_v54 = vld [vmem:[#allocation12 + $0x30] sm:$0xff]  }
  0x5e   :  { %2048 = vmatprep.mubr.bf16.mxu0 %v146_v18  ;;  %v147_v27 = vpack.c.bf16 %v141_v25, %v140_v24  ;;  %v1876_v40 = vld [vmem:[%s2921_s4] ss:$0 sm:$0xff]  ;;  %v2241_v53 = vld [vmem:[#allocation12 + $0x38] sm:$0xff]   ;;  %v2243_v55 = vld [vmem:[#allocation12 + $0x28] sm:$0xff]  }
  0x5f   :  { %2057 = vmatpush3.bf16.msra.mxu1 %v2229_v4  ;;  %v2244_v56 = vld [vmem:[#allocation12 + $0x20] sm:$0xff]   ;;  %v2245_v57 = vld [vmem:[#allocation12 + $0x18] sm:$0xff]   ;;  %v2246_v58 = vld [vmem:[#allocation12 + $0x10] sm:$0xff]  }
  0x60   :  { %2037 = vmatpush3.bf16.msra.mxu0 %v2230_v5  ;;  %2058 = vmatprep.subr.bf16.mxu1 %v2231_v6  ;;  %v2247_v59 = vld [vmem:[#allocation12 + $0x8] sm:$0xff]   ;;  %v2248_v60 = vld [vmem:[#allocation12] sm:$0xff]  }
  0x61   :  { %2038 = vmatprep.subr.bf16.mxu0 %v2232_v7  ;;  %v510_v61 = vld [vmem:[#allocation8] sm:$0xff]  ;;  %v511_v0 = vld [vmem:[#allocation8 + $0x8] sm:$0xff] }
  0x62   :  { %v2687_v62 = vmul.f32 -1e+09, %v510_v61  ;;  %v2690_v4 = vmul.f32 -1e+09, %v511_v0  ;;  %v1894_v25 = vld [vmem:[%s2925_s8] ss:$0 sm:$0xff] }
  0x63   :  { %2059 = vmatpush3.bf16.msra.mxu1 %v2231_v6  ;;  %v512_v6 = vld [vmem:[#allocation8 + $0x10] sm:$0xff]  ;;  %s2538_s8 = smov 96  }
  0x64   :  { %2039 = vmatpush3.bf16.msra.mxu0 %v2232_v7  ;;  %2060 = vmatprep.subr.bf16.mxu1 %v2233_v8  ;;  %v2694_v11 = vmul.f32 -1e+09, %v512_v6 }
  0x65   :  { %2040 = vmatprep.subr.bf16.mxu0 %v2234_v9 }
  0x67   :  { %2061 = vmatpush3.bf16.msra.mxu1 %v2233_v8 }
  0x68   :  { %2041 = vmatpush3.bf16.msra.mxu0 %v2234_v9  ;;  %2062 = vmatprep.subr.bf16.mxu1 %v2235_v10 }
  0x69   :  { %2042 = vmatprep.subr.bf16.mxu0 %v2236_v13 }
  0x6b   :  { %2063 = vmatpush3.bf16.msra.mxu1 %v2235_v10 }
  0x6c   :  { %2043 = vmatpush3.bf16.msra.mxu0 %v2236_v13  ;;  %2064 = vmatprep.subr.bf16.mxu1 %v2237_v17  ;;  %v513_v13 = vld [vmem:[#allocation8 + $0x18] sm:$0xff] }
  0x6d   :  { %2044 = vmatprep.subr.bf16.mxu0 %v2238_v19  ;;  %v2698_v18 = vmul.f32 -1e+09, %v513_v13 }
  0x6f   :  { %2065 = vmatpush3.bf16.msra.mxu1 %v2237_v17 }
  0x70   :  { %2045 = vmatpush3.bf16.msra.mxu0 %v2238_v19  ;;  %2066 = vmatprep.subr.bf16.mxu1 %v2239_v20 }
  0x71   :  { %2046 = vmatprep.subr.bf16.mxu0 %v2240_v21 }
  0x73   :  { %2067 = vmatpush3.bf16.msra.mxu1 %v2239_v20 }
  0x74   :  { %2047 = vmatpush3.bf16.msra.mxu0 %v2240_v21  ;;  %2092 = vmatprep.subr.bf16.mxu1 %v2536_v28 }
  0x75   :  { %2072 = vmatprep.subr.bf16.mxu0 %v2241_v53 }
  0x76   :  { %2069 = vmatmul.mubr.bf16.vlgmr.msra.gmra.mxu1 %v2649_v26 }
  0x77   :  { %2049 = vmatmul.mubr.bf16.vlgmr.msra.gmra.mxu0 %v147_v27  ;;  %2094 = vmatprep.mubr.msk.bf16.mxu1 %vm2537_vm0, %v2536_v28 }
  0x78   :  { %2088 = vmatprep.mubr.bf16.mxu0 %v148_v14  ;;  %2073 = vmatpush3.bf16.msra.mxu0 %v2241_v53 }
  0x79   :  { %2074 = vmatprep.subr.bf16.mxu0 %v2242_v54 }
  0x7c   :  { %2075 = vmatpush3.bf16.msra.mxu0 %v2242_v54 }
  0x7d   :  { %2076 = vmatprep.subr.bf16.mxu0 %v2243_v55 }
  0x80   :  { %2077 = vmatpush3.bf16.msra.mxu0 %v2243_v55 }
  0x81   :  { %2078 = vmatprep.subr.bf16.mxu0 %v2244_v56 }
  0x84   :  { %2079 = vmatpush3.bf16.msra.mxu0 %v2244_v56 }
  0x85   :  { %2080 = vmatprep.subr.bf16.mxu0 %v2245_v57 }
  0x88   :  { %2081 = vmatpush3.bf16.msra.mxu0 %v2245_v57 }
  0x89   :  { %2082 = vmatprep.subr.bf16.mxu0 %v2246_v58 }
  0x8c   :  { %2083 = vmatpush3.bf16.msra.mxu0 %v2246_v58 }
  0x8d   :  { %2084 = vmatprep.subr.bf16.mxu0 %v2247_v59 }
  0x90   :  { %2085 = vmatpush3.bf16.msra.mxu0 %v2247_v59 }
  0x91   :  { %2086 = vmatprep.subr.bf16.mxu0 %v2248_v60 }
  0x94   :  { %2087 = vmatpush3.bf16.msra.mxu0 %v2248_v60 }
  0x95   :  { %2140 = vmatprep.subr.bf16.mxu0 %v2536_v28 }
  0x97   :  { %2089 = vmatmul.mubr.bf16.vlgmr.msra.gmra.mxu0 %v2649_v26 }
  0x98   :  { %2142 = vmatprep.mubr.msk.bf16.mxu0 %vm2537_vm0, %v2536_v28 }
 0x136   :  { %v2070_v29 = vpop.f32.mrf.mxu1 }
 0x137   :  { %v2050_v30 = vpop.f32.mrf.mxu0  ;;  %v384_v44 = vadd.f32 %v2070_v29, %v1885_v34 }
 0x138   :  { %v375_v31 = vpop.f32.mrf.mxu1  ;;  %v264_v50 = vadd.f32 %v2050_v30, %v1876_v40 }
 0x139   :  { %v255_v32 = vpop.f32.mrf.mxu0  ;;  %v376_v37 = vadd.f32 %v1885_v34, %v375_v31 }
 0x13a   :  { %v2071_v33 = vpop.f32.mrf.mxu1  ;;  %v256_v45 = vadd.f32 %v1876_v40, %v255_v32 }
 0x13b   :  { %v2051_v36 = vpop.f32.mrf.mxu0  ;;  %v387_v42 = vadd.f32 %v2071_v33, %v1885_v34 }
 0x13c   :  { %v378_v35 = vpop.f32.mrf.mxu1  ;;  %v267_v51 = vadd.f32 %v2051_v36, %v1876_v40 }
 0x13d   :  { %v379_v38 = vadd.f32 %v1885_v34, %v378_v35  ;;  %v258_v41 = vpop.f32.mrf.mxu0  ;;  %v2666_v47 = vpack.c.bf16 %v387_v42, %v384_v44 }
 0x13e   :  { %v259_v46 = vadd.f32 %v1876_v40, %v258_v41  ;;  %v2677_v52 = vpack.c.bf16 %v267_v51, %v264_v50 }
 0x13f   :  { %v2658_v39 = vpack.c.bf16 %v379_v38, %v376_v37  ;;  %v576_v49 = vsel %vm524_vm1, %v2666_v47, 0 }
 0x140   :  { %v2668_v48 = vpack.c.bf16 %v259_v46, %v256_v45 }
 0x141   :  { %v529_v43 = vsel %vm524_vm1, %v2658_v39, 0 }
 0x142   :  { %2093 = vmatpush3.bf16.xpose.msra.mxu1 %v529_v43 }
 0x143   :  { %2098 = vmatprep.subr.bf16.mxu1 %v2536_v28 }
 0x149   :  { %2095 = vmatmul.mubr.msk.bf16.vlgmr.msra.gmra.mxu1 %vm524_vm1, %v2668_v48 }
 0x14a   :  { %2099 = vmatpush3.bf16.xpose.msra.mxu1 %v576_v49  ;;  %2100 = vmatprep.mubr.msk.bf16.mxu1 %vm2537_vm0, %v2536_v28 }
 0x14b   :  { %2104 = vmatprep.subr.bf16.mxu1 %v2536_v28 }
 0x151   :  { %2101 = vmatmul.mubr.msk.bf16.vlgmr.msra.gmra.mxu1 %vm524_vm1, %v2677_v52 }
 0x152   :  { %2106 = vmatprep.mubr.msk.bf16.mxu1 %vm2537_vm0, %v2536_v28 }
 0x157   :  { %v2090_v26 = vpop.f32.mrf.mxu0 }
 0x158   :  { %v504_v27 = vadd.f32 %v2090_v26, %v1894_v25 }
 0x159   :  { %v495_v51 = vpop.f32.mrf.mxu0 }
 0x15a   :  { %v496_v55 = vadd.f32 %v1894_v25, %v495_v51 }
 0x15b   :  { %v2091_v54 = vpop.f32.mrf.mxu0 }
 0x15c   :  { %v507_v56 = vadd.f32 %v2091_v54, %v1894_v25 }
 0x15d   :  { %v498_v57 = vpop.f32.mrf.mxu0 }
 0x15e   :  { %v2710_v58 = vpack.c.bf16 %v507_v56, %v504_v27  ;;  %v499_v59 = vadd.f32 %v1894_v25, %v498_v57 }
 0x160   :  { %v2712_v60 = vpack.c.bf16 %v499_v59, %v496_v55 }
 0x162   :  { %2105 = vmatpush3.bf16.msra.mxu1 %v2712_v60 }
 0x163   :  { %2110 = vmatprep.subr.bf16.mxu1 %v2536_v28 }
 0x209   :  { %v565_v63 = vpop.f32.mrf.mxu1 }
 0x20a   :  { %v619_v1 = vmul.f32 0.17677669, %v565_v63 }
 0x20b   :  { %v2096_v2 = vpop.f32.mrf.mxu1 }
 0x20c   :  { %v623_v3 = vadd.f32 %v619_v1, %v2687_v62 }
 0x20d   :  { %v568_v5 = vpop.f32.mrf.mxu1 }
 0x20e   :  { %v620_v7 = vmul.f32 0.17677669, %v568_v5  ;;  %v628_v8 = vsel %vm627_vm2, %v623_v3, -inf }
 0x20f   :  { %629 = vmax.xlane.f32.xlu0 %v628_v8  ;;  %v2097_v9 = vpop.f32.mrf.mxu1 }
 0x210   :  { %v624_v10 = vadd.f32 %v620_v7, %v2690_v4 }
 0x211   :  { %v612_v12 = vpop.f32.mrf.mxu1 }
 0x212   :  { %v621_v14 = vmul.f32 0.17677669, %v612_v12  ;;  %v631_v15 = vsel %vm627_vm2, %v624_v10, -inf }
 0x213   :  { %632 = vmax.xlane.f32.xlu0 %v631_v15  ;;  %v2102_v16 = vpop.f32.mrf.mxu1 }
 0x214   :  { %v625_v17 = vadd.f32 %v621_v14, %v2694_v11 }
 0x215   :  { %v615_v19 = vpop.f32.mrf.mxu1 }
 0x216   :  { %v622_v20 = vmul.f32 0.17677669, %v615_v19  ;;  %v634_v21 = vsel %vm627_vm2, %v625_v17, -inf }
 0x217   :  { %635 = vmax.xlane.f32.xlu1 %v634_v21  ;;  %v2103_v22 = vpop.f32.mrf.mxu1 }
 0x218   :  { %v626_v23 = vadd.f32 %v622_v20, %v2698_v18 }
 0x21a   :  { %v637_v24 = vsel %vm627_vm2, %v626_v23, -inf }
 0x21b   :  { %638 = vmax.xlane.f32.xlu1 %v637_v24 }
 0x298   :  { %v630_v29 = vpop.xlane.xlu0 %629 }
 0x299   :  { %v640_v30 = vsub.f32 %v623_v3, %v630_v29 }
 0x29b   :  { %v644_v31 = vmul.f32 1.442695, %v640_v30 }
 0x29c   :  { %v633_v32 = vpop.xlane.xlu0 %632 }
 0x29d   :  { %2257 = vpow2.f32 %v644_v31  ;;  %v641_v33 = vsub.f32 %v624_v10, %v633_v32 }
 0x29f   :  { %v646_v34 = vmul.f32 1.442695, %v641_v33 }
 0x2a0   :  { %v636_v35 = vpop.xlane.xlu1 %635 }
 0x2a1   :  { %2259 = vpow2.f32 %v646_v34  ;;  %v642_v36 = vsub.f32 %v625_v17, %v636_v35 }
 0x2a3   :  { %v648_v37 = vmul.f32 1.442695, %v642_v36 }
 0x2a4   :  { %v639_v38 = vpop.xlane.xlu1 %638 }
 0x2a5   :  { %2261 = vpow2.f32 %v648_v37  ;;  %v643_v40 = vsub.f32 %v626_v23, %v639_v38 }
 0x2a7   :  { %v650_v41 = vmul.f32 1.442695, %v643_v40 }
 0x2a9   :  { %2263 = vpow2.f32 %v650_v41 }
 0x2aa   :  { %v2258_v42 = vpop.eup %2257 }
 0x2ab   :  { %v652_v43 = vsel %vm627_vm2, %v2258_v42, 0.0 }
 0x2ac   :  { %653 = vadd.xlane.f32.xlu0 %v652_v43 }
 0x2ae   :  { %v2260_v44 = vpop.eup %2259 }
 0x2af   :  { %v655_v45 = vsel %vm627_vm2, %v2260_v44, 0.0 }
 0x2b0   :  { %656 = vadd.xlane.f32.xlu1 %v655_v45 }
 0x2b2   :  { %v2262_v46 = vpop.eup %2261 }
 0x2b3   :  { %v658_v49 = vsel %vm627_vm2, %v2262_v46, 0.0 }
 0x2b4   :  { %659 = vadd.xlane.f32.xlu0 %v658_v49 }
 0x2b6   :  { %v2264_v50 = vpop.eup %2263 }
 0x2b7   :  { %v661_v53 = vsel %vm627_vm2, %v2264_v50, 0.0 }
 0x2b8   :  { %662 = vadd.xlane.f32.xlu1 %v661_v53 }
 0x2c9   :  { %786 = vrot.lane.b32.xlu1 %v2668_v48, %s2538_s8 }
 0x2ca   :  { %789 = vrot.lane.b32.xlu0 %v2658_v39, %s2538_s8 }
 0x2cd   :  { %842 = vrot.lane.b32.xlu1 %v2666_v47, %s2538_s8 }
 0x2d1   :  { %839 = vrot.lane.b32.xlu1 %v2677_v52, %s2538_s8 }
 0x335   :  { %v654_v61 = vpop.xlane.xlu0 %653 }
 0x336   :  { %2265 = vrcp.f32 %v654_v61 }
 0x339   :  { %v657_v63 = vpop.xlane.xlu1 %656 }
 0x33a   :  { %2267 = vrcp.f32 %v657_v63 }
 0x33d   :  { %v660_v0 = vpop.xlane.xlu0 %659 }
 0x33e   :  { %2269 = vrcp.f32 %v660_v0 }
 0x341   :  { %v663_v1 = vpop.xlane.xlu1 %662  ;;  %v790_v16 = vpop.permute.xlu0 %789 }
 0x342   :  { %2271 = vrcp.f32 %v663_v1  ;;  %v795_v21 = vsel %vm524_vm1, %v790_v16, 0 }
 0x343   :  { %v2266_v2 = vpop.eup %2265 }
 0x344   :  { %v668_v3 = vmul.f32 %v2266_v2, %v2258_v42 }
 0x345   :  { %v787_v20 = vpop.permute.xlu1 %786 }
 0x346   :  { %v1944_v5 = vpack.c.bf16 %v668_v3, %v668_v3 }
 0x347   :  { %v2268_v6 = vpop.eup %2267 }
 0x348   :  { %v669_v7 = vmul.f32 %v2268_v6, %v2260_v44  ;;  %689 = vst.msk [vmem:[#allocation16] sm:$0xf] %vm688_vm3, %v1944_v5 }
 0x349   :  { %v843_v22 = vpop.permute.xlu1 %842 }
 0x34a   :  { %v672_v8 = vpack.c.bf16 %v669_v7, %v668_v3  ;;  %v1945_v9 = vpack.c.bf16 %v669_v7, %v669_v7  ;;  %v848_v23 = vsel %vm524_vm1, %v843_v22, 0 }
 0x34b   :  { %v2270_v10 = vpop.eup %2269 }
 0x34c   :  { %690 = vst.msk [vmem:[#allocation16 + $0x4] sm:$0xf] %vm688_vm3, %v1945_v9  ;;  %2107 = vmatmul.mubr.msk.bf16.vlgmr.msra.gmra.mxu1 %vm627_vm2, %v672_v8  ;;  %v670_v12 = vmul.f32 %v2270_v10, %v2262_v46 }
 0x34d   :  { %2111 = vmatpush3.bf16.msra.mxu1 %v2710_v58  ;;  %2112 = vmatprep.mubr.msk.bf16.mxu1 %vm2537_vm0, %v2536_v28  ;;  %v840_v24 = vpop.permute.xlu1 %839 }
 0x34e   :  { %2116 = vmatprep.subr.bf16.mxu1 %v2536_v28  ;;  %v1946_v13 = vpack.c.bf16 %v670_v12, %v670_v12 }
 0x34f   :  { %v2272_v14 = vpop.eup %2271 }
 0x350   :  { %v671_v15 = vmul.f32 %v2272_v14, %v2264_v50  ;;  %691 = vst.msk [vmem:[#allocation16 + $0x20] sm:$0xf] %vm688_vm3, %v1946_v13 }
 0x352   :  { %v673_v17 = vpack.c.bf16 %v671_v15, %v670_v12  ;;  %v1947_v19 = vpack.c.bf16 %v671_v15, %v671_v15 }
 0x354   :  { %692 = vst.msk [vmem:[#allocation16 + $0x24] sm:$0xf] %vm688_vm3, %v1947_v19  ;;  %2113 = vmatmul.mubr.msk.bf16.vlgmr.msra.gmra.mxu1 %vm627_vm2, %v673_v17 }
 0x355   :  { %2117 = vmatpush3.bf16.xpose.msra.mxu1 %v795_v21  ;;  %2118 = vmatprep.mubr.msk.bf16.mxu1 %vm2537_vm0, %v2536_v28 }
 0x356   :  { %2122 = vmatprep.subr.bf16.mxu1 %v2536_v28 }
 0x35c   :  { %2119 = vmatmul.mubr.msk.bf16.vlgmr.msra.gmra.mxu1 %vm524_vm1, %v787_v20 }
 0x35d   :  { %2123 = vmatpush3.bf16.xpose.msra.mxu1 %v848_v23  ;;  %2124 = vmatprep.mubr.msk.bf16.mxu1 %vm2537_vm0, %v2536_v28 }
 0x35e   :  { %2128 = vmatprep.subr.bf16.mxu1 %v2536_v28 }
 0x364   :  { %2125 = vmatmul.mubr.msk.bf16.vlgmr.msra.gmra.mxu1 %vm524_vm1, %v840_v24 }
 0x365   :  { %2130 = vmatprep.mubr.msk.bf16.mxu1 %vm2537_vm0, %v2536_v28 }
 0x40c   :  { %v730_v25 = vpop.f32.mrf.mxu1 }
 0x40d   :  { %781 = vst.msk [vmem:[#allocation2] sm:$0xff] %vm524_vm1, %v730_v25 }
 0x40e   :  { %v2108_v26 = vpop.f32.mrf.mxu1 }
 0x410   :  { %v733_v27 = vpop.f32.mrf.mxu1 }
 0x411   :  { %782 = vst.msk [vmem:[#allocation2 + $0x8] sm:$0xff] %vm524_vm1, %v733_v27 }
 0x412   :  { %v2109_v29 = vpop.f32.mrf.mxu1 }
 0x414   :  { %v774_v30 = vpop.f32.mrf.mxu1 }
 0x415   :  { %783 = vst.msk [vmem:[#allocation2 + $0x10] sm:$0xff] %vm524_vm1, %v774_v30 }
 0x416   :  { %v2114_v31 = vpop.f32.mrf.mxu1 }
 0x418   :  { %v777_v32 = vpop.f32.mrf.mxu1 }
 0x419   :  { %784 = vst.msk [vmem:[#allocation2 + $0x18] sm:$0xff] %vm524_vm1, %v777_v32 }
 0x41a   :  { %v2115_v33 = vpop.f32.mrf.mxu1 }
 0x41c   :  { %v831_v34 = vpop.f32.mrf.mxu1 }
 0x41d   :  { %v891_v35 = vmul.f32 0.17677669, %v831_v34 }
 0x41e   :  { %v2120_v36 = vpop.f32.mrf.mxu1 }
 0x41f   :  { %v895_v37 = vadd.f32 %v891_v35, %v2687_v62 }
 0x420   :  { %v834_v38 = vpop.f32.mrf.mxu1 }
 0x421   :  { %v892_v40 = vmul.f32 0.17677669, %v834_v38  ;;  %v899_v41 = vsel %vm627_vm2, %v895_v37, -inf }
 0x422   :  { %900 = vmax.xlane.f32.xlu0 %v899_v41  ;;  %v2121_v42 = vpop.f32.mrf.mxu1 }
 0x423   :  { %v896_v43 = vadd.f32 %v892_v40, %v2690_v4 }
 0x424   :  { %v884_v44 = vpop.f32.mrf.mxu1 }
 0x425   :  { %v893_v45 = vmul.f32 0.17677669, %v884_v44  ;;  %v902_v46 = vsel %vm627_vm2, %v896_v43, -inf }
 0x426   :  { %903 = vmax.xlane.f32.xlu1 %v902_v46  ;;  %v2126_v49 = vpop.f32.mrf.mxu1 }
 0x427   :  { %v897_v50 = vadd.f32 %v893_v45, %v2694_v11 }
 0x428   :  { %v887_v51 = vpop.f32.mrf.mxu1 }
 0x429   :  { %v894_v53 = vmul.f32 0.17677669, %v887_v51  ;;  %v905_v54 = vsel %vm627_vm2, %v897_v50, -inf }
 0x42a   :  { %906 = vmax.xlane.f32.xlu0 %v905_v54  ;;  %v2127_v55 = vpop.f32.mrf.mxu1 }
 0x42b   :  { %v898_v56 = vadd.f32 %v894_v53, %v2698_v18 }
 0x42d   :  { %v908_v57 = vsel %vm627_vm2, %v898_v56, -inf }
 0x42e   :  { %909 = vmax.xlane.f32.xlu0 %v908_v57 }
 0x4ab   :  { %v901_v59 = vpop.xlane.xlu0 %900 }
 0x4ac   :  { %v911_v61 = vsub.f32 %v895_v37, %v901_v59 }
 0x4ae   :  { %v915_v63 = vmul.f32 1.442695, %v911_v61 }
 0x4af   :  { %v904_v0 = vpop.xlane.xlu1 %903 }
 0x4b0   :  { %2273 = vpow2.f32 %v915_v63  ;;  %v912_v1 = vsub.f32 %v896_v43, %v904_v0 }
 0x4b2   :  { %v917_v2 = vmul.f32 1.442695, %v912_v1 }
 0x4b3   :  { %v907_v3 = vpop.xlane.xlu0 %906 }
 0x4b4   :  { %2275 = vpow2.f32 %v917_v2  ;;  %v913_v5 = vsub.f32 %v897_v50, %v907_v3 }
 0x4b6   :  { %v919_v6 = vmul.f32 1.442695, %v913_v5 }
 0x4b7   :  { %v910_v14 = vpop.xlane.xlu0 %909 }
 0x4b8   :  { %2277 = vpow2.f32 %v919_v6  ;;  %v914_v15 = vsub.f32 %v898_v56, %v910_v14 }
 0x4ba   :  { %v921_v16 = vmul.f32 1.442695, %v914_v15 }
 0x4bc   :  { %2279 = vpow2.f32 %v921_v16 }
 0x4bd   :  { %v2274_v7 = vpop.eup %2273 }
 0x4be   :  { %v923_v8 = vsel %vm627_vm2, %v2274_v7, 0.0 }
 0x4bf   :  { %924 = vadd.xlane.f32.xlu0 %v923_v8 }
 0x4c1   :  { %v2276_v9 = vpop.eup %2275 }
 0x4c2   :  { %v926_v10 = vsel %vm627_vm2, %v2276_v9, 0.0 }
 0x4c3   :  { %927 = vadd.xlane.f32.xlu1 %v926_v10 }
 0x4c5   :  { %v2278_v12 = vpop.eup %2277 }
 0x4c6   :  { %v929_v13 = vsel %vm627_vm2, %v2278_v12, 0.0 }
 0x4c7   :  { %930 = vadd.xlane.f32.xlu0 %v929_v13 }
 0x4c9   :  { %v2280_v17 = vpop.eup %2279 }
 0x4ca   :  { %v932_v19 = vsel %vm627_vm2, %v2280_v17, 0.0 }
 0x4d4   :  { %1013 = vrot.lane.b32.xlu1 %v2710_v58, %s2538_s8 }
 0x4d8   :  { %1083 = vrot.lane.b32.xlu1 %v2658_v39, %s2529_s13 }
 0x4dd   :  { %965 = vrot.lane.b32.xlu0 %v2712_v60, %s2538_s8 }
 0x4e1   :  { %1081 = vrot.lane.b32.xlu0 %v2668_v48, %s2529_s13 }
 0x4fc   :  { %933 = vadd.xlane.f32.xlu1 %v932_v19 }
 0x50d   :  { %1134 = vrot.lane.b32.xlu1 %v2666_v47, %s2529_s13 }
 0x511   :  { %1132 = vrot.lane.b32.xlu1 %v2677_v52, %s2529_s13 }
 0x548   :  { %v925_v20 = vpop.xlane.xlu0 %924 }
 0x549   :  { %2281 = vrcp.f32 %v925_v20 }
 0x54c   :  { %v928_v21 = vpop.xlane.xlu1 %927 }
 0x54d   :  { %2283 = vrcp.f32 %v928_v21 }
 0x550   :  { %v1014_v22 = vpop.permute.xlu1 %1013  ;;  %v931_v23 = vpop.xlane.xlu0 %930 }
 0x551   :  { %2285 = vrcp.f32 %v931_v23 }
 0x554   :  { %v1084_v24 = vpop.permute.xlu1 %1083  ;;  %v966_v25 = vpop.permute.xlu0 %965 }
 0x555   :  { %v1089_v26 = vsel %vm524_vm1, %v1084_v24, 0  ;;  %2129 = vmatpush3.bf16.msra.mxu1 %v966_v25 }
 0x556   :  { %v2282_v27 = vpop.eup %2281  ;;  %2141 = vmatpush3.bf16.xpose.msra.mxu0 %v1089_v26  ;;  %2134 = vmatprep.subr.bf16.mxu1 %v2536_v28 }
 0x557   :  { %v939_v29 = vmul.f32 %v2282_v27, %v2274_v7  ;;  %2152 = vmatprep.subr.bf16.mxu0 %v2536_v28 }
 0x558   :  { %v1082_v33 = vpop.permute.xlu0 %1081 }
 0x559   :  { %v1948_v30 = vpack.c.bf16 %v939_v29, %v939_v29 }
 0x55a   :  { %v2284_v31 = vpop.eup %2283 }
 0x55b   :  { %v940_v32 = vmul.f32 %v2284_v31, %v2276_v9  ;;  %960 = vst.msk [vmem:[#allocation16 + $0x8] sm:$0xf] %vm688_vm3, %v1948_v30 }
 0x55d   :  { %2143 = vmatmul.mubr.msk.bf16.vlgmr.msra.gmra.mxu0 %vm524_vm1, %v1082_v33  ;;  %v943_v34 = vpack.c.bf16 %v940_v32, %v939_v29  ;;  %v1949_v35 = vpack.c.bf16 %v940_v32, %v940_v32 }
 0x55e   :  { %v2286_v36 = vpop.eup %2285  ;;  %2154 = vmatprep.mubr.msk.bf16.mxu0 %vm2537_vm0, %v2536_v28 }
 0x55f   :  { %961 = vst.msk [vmem:[#allocation16 + $0xc] sm:$0xf] %vm688_vm3, %v1949_v35  ;;  %2131 = vmatmul.mubr.msk.bf16.vlgmr.msra.gmra.mxu1 %vm627_vm2, %v943_v34  ;;  %v941_v37 = vmul.f32 %v2286_v36, %v2278_v12 }
 0x560   :  { %2135 = vmatpush3.bf16.msra.mxu1 %v1014_v22  ;;  %2136 = vmatprep.mubr.msk.bf16.mxu1 %vm2537_vm0, %v2536_v28 }
 0x561   :  { %2146 = vmatprep.subr.bf16.mxu1 %v2536_v28  ;;  %v1950_v38 = vpack.c.bf16 %v941_v37, %v941_v37 }
 0x563   :  { %962 = vst.msk [vmem:[#allocation16 + $0x28] sm:$0xf] %vm688_vm3, %v1950_v38 }
 0x585   :  { %v934_v40 = vpop.xlane.xlu1 %933 }
 0x586   :  { %2287 = vrcp.f32 %v934_v40 }
 0x589   :  { %v1135_v43 = vpop.permute.xlu1 %1134 }
 0x58a   :  { %v1140_v46 = vsel %vm524_vm1, %v1135_v43, 0 }
 0x58d   :  { %v1133_v49 = vpop.permute.xlu1 %1132 }
 0x593   :  { %v2288_v41 = vpop.eup %2287 }
 0x594   :  { %v942_v42 = vmul.f32 %v2288_v41, %v2280_v17 }
 0x596   :  { %v944_v44 = vpack.c.bf16 %v942_v42, %v941_v37  ;;  %v1951_v45 = vpack.c.bf16 %v942_v42, %v942_v42 }
 0x598   :  { %963 = vst.msk [vmem:[#allocation16 + $0x2c] sm:$0xf] %vm688_vm3, %v1951_v45  ;;  %2137 = vmatmul.mubr.msk.bf16.vlgmr.msra.gmra.mxu1 %vm627_vm2, %v944_v44 }
 0x599   :  { %2147 = vmatpush3.bf16.xpose.msra.mxu1 %v1140_v46  ;;  %2148 = vmatprep.mubr.msk.bf16.mxu1 %vm2537_vm0, %v2536_v28 }
 0x59a   :  { %2158 = vmatprep.subr.bf16.mxu1 %v2536_v28 }
 0x5a0   :  { %2149 = vmatmul.mubr.msk.bf16.vlgmr.msra.gmra.mxu1 %vm524_vm1, %v1133_v49 }
 0x5a1   :  { %2160 = vmatprep.mubr.msk.bf16.mxu1 %vm2537_vm0, %v2536_v28 }
 0x61d   :  { %v1125_v50 = vpop.f32.mrf.mxu0 }
 0x61e   :  { %v1183_v51 = vmul.f32 0.17677669, %v1125_v50 }
 0x61f   :  { %v2796_v53 = vpop.f32.mrf.mxu1  ;;  %v2144_v54 = vpop.f32.mrf.mxu0 }
 0x620   :  { %v1187_v55 = vadd.f32 %v1183_v51, %v2687_v62 }
 0x621   :  { %v2132_v56 = vpop.f32.mrf.mxu1  ;;  %v1128_v57 = vpop.f32.mrf.mxu0 }
 0x622   :  { %v1184_v59 = vmul.f32 0.17677669, %v1128_v57  ;;  %v1191_v61 = vsel %vm627_vm2, %v1187_v55, -inf }
 0x623   :  { %1192 = vmax.xlane.f32.xlu0 %v1191_v61  ;;  %v2800_v63 = vpop.f32.mrf.mxu1  ;;  %v2145_v0 = vpop.f32.mrf.mxu0 }
 0x624   :  { %v1188_v1 = vadd.f32 %v1184_v59, %v2690_v4 }
 0x625   :  { %v2133_v2 = vpop.f32.mrf.mxu1 }
 0x626   :  { %v1194_v3 = vsel %vm627_vm2, %v1188_v1, -inf }
 0x627   :  { %1195 = vmax.xlane.f32.xlu1 %v1194_v3 }
 0x658   :  { %v2804_v5 = vpop.f32.mrf.mxu1 }
 0x65a   :  { %v2138_v6 = vpop.f32.mrf.mxu1 }
 0x65c   :  { %v2806_v7 = vpop.f32.mrf.mxu1 }
 0x65e   :  { %v2139_v8 = vpop.f32.mrf.mxu1 }
 0x660   :  { %v1176_v9 = vpop.f32.mrf.mxu1 }
 0x661   :  { %v1185_v10 = vmul.f32 0.17677669, %v1176_v9 }
 0x662   :  { %v2150_v12 = vpop.f32.mrf.mxu1 }
 0x663   :  { %v1189_v13 = vadd.f32 %v1185_v10, %v2694_v11 }
 0x664   :  { %v1179_v14 = vpop.f32.mrf.mxu1 }
 0x665   :  { %v1186_v15 = vmul.f32 0.17677669, %v1179_v14  ;;  %v1197_v16 = vsel %vm627_vm2, %v1189_v13, -inf }
 0x666   :  { %1198 = vmax.xlane.f32.xlu0 %v1197_v16  ;;  %v2151_v17 = vpop.f32.mrf.mxu1 }
 0x667   :  { %v1190_v19 = vadd.f32 %v1186_v15, %v2698_v18 }
 0x669   :  { %v1200_v20 = vsel %vm627_vm2, %v1190_v19, -inf }
 0x66a   :  { %1201 = vmax.xlane.f32.xlu0 %v1200_v20 }
 0x6ac   :  { %v1193_v21 = vpop.xlane.xlu0 %1192 }
 0x6ad   :  { %v1203_v22 = vsub.f32 %v1187_v55, %v1193_v21 }
 0x6af   :  { %v1207_v23 = vmul.f32 1.442695, %v1203_v22 }
 0x6b0   :  { %v1196_v24 = vpop.xlane.xlu1 %1195 }
 0x6b1   :  { %2289 = vpow2.f32 %v1207_v23  ;;  %v1204_v25 = vsub.f32 %v1188_v1, %v1196_v24 }
 0x6b3   :  { %v1209_v26 = vmul.f32 1.442695, %v1204_v25 }
 0x6b5   :  { %2291 = vpow2.f32 %v1209_v26 }
 0x6be   :  { %v2290_v27 = vpop.eup %2289 }
 0x6bf   :  { %v1215_v29 = vsel %vm627_vm2, %v2290_v27, 0.0 }
 0x6c0   :  { %1216 = vadd.xlane.f32.xlu0 %v1215_v29 }
 0x6c2   :  { %v2292_v30 = vpop.eup %2291 }
 0x6c3   :  { %v1218_v31 = vsel %vm627_vm2, %v2292_v30, 0.0 }
 0x6c4   :  { %1219 = vadd.xlane.f32.xlu1 %v1218_v31 }
 0x6d5   :  { %1303 = vrot.lane.b32.xlu1 %v2710_v58, %s2529_s13 }
 0x6d9   :  { %1373 = vrot.lane.b32.xlu1 %v2658_v39, %s2539_s23 }
 0x6ef   :  { %v1199_v32 = vpop.xlane.xlu0 %1198 }
 0x6f0   :  { %v1205_v33 = vsub.f32 %v1189_v13, %v1199_v32 }
 0x6f2   :  { %v1211_v34 = vmul.f32 1.442695, %v1205_v33 }
 0x6f3   :  { %v1202_v35 = vpop.xlane.xlu0 %1201 }
 0x6f4   :  { %2293 = vpow2.f32 %v1211_v34  ;;  %v1206_v36 = vsub.f32 %v1190_v19, %v1202_v35 }
 0x6f6   :  { %v1213_v37 = vmul.f32 1.442695, %v1206_v36 }
 0x6f8   :  { %2295 = vpow2.f32 %v1213_v37 }
 0x701   :  { %v2294_v38 = vpop.eup %2293 }
 0x702   :  { %v1221_v40 = vsel %vm627_vm2, %v2294_v38, 0.0 }
 0x703   :  { %1222 = vadd.xlane.f32.xlu0 %v1221_v40 }
 0x705   :  { %v2296_v41 = vpop.eup %2295 }
 0x706   :  { %v1224_v42 = vsel %vm627_vm2, %v2296_v41, 0.0 }
 0x707   :  { %1225 = vadd.xlane.f32.xlu1 %v1224_v42 }
 0x718   :  { %1424 = vrot.lane.b32.xlu1 %v2666_v47, %s2539_s23 }
 0x719   :  { %1256 = vrot.lane.b32.xlu0 %v2712_v60, %s2529_s13 }
 0x71c   :  { %1422 = vrot.lane.b32.xlu1 %v2677_v52, %s2539_s23 }
 0x71d   :  { %1371 = vrot.lane.b32.xlu0 %v2668_v48, %s2539_s23 }
 0x749   :  { %v1217_v39 = vpop.xlane.xlu0 %1216 }
 0x74a   :  { %2297 = vrcp.f32 %v1217_v39 }
 0x74d   :  { %v1220_v43 = vpop.xlane.xlu1 %1219 }
 0x74e   :  { %2299 = vrcp.f32 %v1220_v43 }
 0x751   :  { %v1304_v44 = vpop.permute.xlu1 %1303 }
 0x752   :  { %2159 = vmatpush3.bf16.msra.mxu1 %v1304_v44 }
 0x753   :  { %2170 = vmatprep.subr.bf16.mxu1 %v2536_v28 }
 0x755   :  { %v1374_v52 = vpop.permute.xlu1 %1373 }
 0x756   :  { %v1379_v57 = vsel %vm524_vm1, %v1374_v52, 0 }
 0x757   :  { %v2298_v45 = vpop.eup %2297 }
 0x758   :  { %v1231_v46 = vmul.f32 %v2298_v45, %v2290_v27 }
 0x75a   :  { %v1952_v47 = vpack.c.bf16 %v1231_v46, %v1231_v46 }
 0x75b   :  { %v2300_v49 = vpop.eup %2299 }
 0x75c   :  { %v1232_v50 = vmul.f32 %v2300_v49, %v2292_v30  ;;  %1252 = vst.msk [vmem:[#allocation16 + $0x10] sm:$0xf] %vm688_vm3, %v1952_v47 }
 0x75e   :  { %v1953_v51 = vpack.c.bf16 %v1232_v50, %v1232_v50  ;;  %v1235_v56 = vpack.c.bf16 %v1232_v50, %v1231_v46 }
 0x760   :  { %1253 = vst.msk [vmem:[#allocation16 + $0x14] sm:$0xf] %vm688_vm3, %v1953_v51 }
 0x78c   :  { %v1223_v48 = vpop.xlane.xlu0 %1222 }
 0x78d   :  { %2301 = vrcp.f32 %v1223_v48 }
 0x790   :  { %v1226_v54 = vpop.xlane.xlu1 %1225  ;;  %v1257_v55 = vpop.permute.xlu0 %1256 }
 0x791   :  { %2303 = vrcp.f32 %v1226_v54  ;;  %2153 = vmatpush3.bf16.msra.mxu0 %v1257_v55 }
 0x792   :  { %2164 = vmatprep.subr.bf16.mxu0 %v2536_v28 }
 0x794   :  { %2155 = vmatmul.mubr.msk.bf16.vlgmr.msra.gmra.mxu0 %vm627_vm2, %v1235_v56  ;;  %v1372_v61 = vpop.permute.xlu0 %1371  ;;  %v1425_v6 = vpop.permute.xlu1 %1424 }
 0x795   :  { %2165 = vmatpush3.bf16.xpose.msra.mxu0 %v1379_v57  ;;  %2166 = vmatprep.mubr.msk.bf16.mxu0 %vm2537_vm0, %v2536_v28  ;;  %v1430_v10 = vsel %vm524_vm1, %v1425_v6, 0 }
 0x796   :  { %2176 = vmatprep.subr.bf16.mxu0 %v2536_v28 }
 0x798   :  { %v1423_v12 = vpop.permute.xlu1 %1422 }
 0x79a   :  { %v2302_v59 = vpop.eup %2301 }
 0x79b   :  { %v1233_v0 = vmul.f32 %v2302_v59, %v2294_v38 }
 0x79c   :  { %2167 = vmatmul.mubr.msk.bf16.vlgmr.msra.gmra.mxu0 %vm524_vm1, %v1372_v61 }
 0x79d   :  { %v1954_v1 = vpack.c.bf16 %v1233_v0, %v1233_v0  ;;  %2178 = vmatprep.mubr.msk.bf16.mxu0 %vm2537_vm0, %v2536_v28 }
 0x79e   :  { %v2304_v2 = vpop.eup %2303 }
 0x79f   :  { %v1234_v3 = vmul.f32 %v2304_v2, %v2296_v41  ;;  %1254 = vst.msk [vmem:[#allocation16 + $0x30] sm:$0xf] %vm688_vm3, %v1954_v1 }
 0x7a1   :  { %v1236_v8 = vpack.c.bf16 %v1234_v3, %v1233_v0  ;;  %v1955_v9 = vpack.c.bf16 %v1234_v3, %v1234_v3 }
 0x7a3   :  { %1255 = vst.msk [vmem:[#allocation16 + $0x34] sm:$0xf] %vm688_vm3, %v1955_v9  ;;  %2161 = vmatmul.mubr.msk.bf16.vlgmr.msra.gmra.mxu1 %vm627_vm2, %v1236_v8 }
 0x7a4   :  { %2171 = vmatpush3.bf16.xpose.msra.mxu1 %v1430_v10  ;;  %2172 = vmatprep.mubr.msk.bf16.mxu1 %vm2537_vm0, %v2536_v28 }
 0x7a5   :  { %2182 = vmatprep.subr.bf16.mxu1 %v2536_v28 }
 0x7ab   :  { %2173 = vmatmul.mubr.msk.bf16.vlgmr.msra.gmra.mxu1 %vm524_vm1, %v1423_v12 }
 0x7ac   :  { %2184 = vmatprep.mubr.msk.bf16.mxu1 %vm2537_vm0, %v2536_v28 }
 0x854   :  { %v2850_v13 = vpop.f32.mrf.mxu0 }
 0x856   :  { %v2156_v14 = vpop.f32.mrf.mxu0 }
 0x858   :  { %v2852_v15 = vpop.f32.mrf.mxu0 }
 0x85a   :  { %v2157_v16 = vpop.f32.mrf.mxu0 }
 0x85c   :  { %v1415_v17 = vpop.f32.mrf.mxu0 }
 0x85d   :  { %v1473_v19 = vmul.f32 0.17677669, %v1415_v17 }
 0x85e   :  { %v2168_v20 = vpop.f32.mrf.mxu0 }
 0x85f   :  { %v1477_v21 = vadd.f32 %v1473_v19, %v2687_v62 }
 0x860   :  { %v1418_v22 = vpop.f32.mrf.mxu0 }
 0x861   :  { %v1474_v23 = vmul.f32 0.17677669, %v1418_v22  ;;  %v1481_v24 = vsel %vm627_vm2, %v1477_v21, -inf }
 0x862   :  { %1482 = vmax.xlane.f32.xlu0 %v1481_v24  ;;  %v2169_v25 = vpop.f32.mrf.mxu0 }
 0x863   :  { %v1343_v26 = vpop.f32.mrf.mxu1  ;;  %v1478_v28 = vadd.f32 %v1474_v23, %v2690_v4 }
 0x865   :  { %v2162_v27 = vpop.f32.mrf.mxu1  ;;  %v1484_v29 = vsel %vm627_vm2, %v1478_v28, -inf }
 0x866   :  { %1485 = vmax.xlane.f32.xlu1 %v1484_v29  ;;  %v2251_v27 = vld [vmem:[#allocation14 + $0x28] sm:$0xff]   ;;  %v2252_v29 = vld [vmem:[#allocation14 + $0x20] sm:$0xff]  }
 0x867   :  { %v1346_v30 = vpop.f32.mrf.mxu1 }
 0x869   :  { %v2163_v31 = vpop.f32.mrf.mxu1 }
 0x86b   :  { %v1466_v32 = vpop.f32.mrf.mxu1 }
 0x86c   :  { %v1475_v33 = vmul.f32 0.17677669, %v1466_v32 }
 0x86d   :  { %v2174_v34 = vpop.f32.mrf.mxu1 }
 0x86e   :  { %v1479_v62 = vadd.f32 %v1475_v33, %v2694_v11  ;;  %v2254_v33 = vld [vmem:[#allocation14 + $0x10] sm:$0xff]  }
 0x86f   :  { %v1469_v35 = vpop.f32.mrf.mxu1 }
 0x870   :  { %v1476_v36 = vmul.f32 0.17677669, %v1469_v35  ;;  %v1487_v37 = vsel %vm627_vm2, %v1479_v62, -inf  ;;  %v2255_v35 = vld [vmem:[#allocation14 + $0x8] sm:$0xff]  }
 0x871   :  { %1488 = vmax.xlane.f32.xlu0 %v1487_v37  ;;  %v2175_v38 = vpop.f32.mrf.mxu1 }
 0x872   :  { %v1480_v40 = vadd.f32 %v1476_v36, %v2698_v18  ;;  %v2256_v36 = vld [vmem:[#allocation14] sm:$0xff]  }
 0x874   :  { %v1490_v4 = vsel %vm627_vm2, %v1480_v40, -inf }
 0x875   :  { %1491 = vmax.xlane.f32.xlu0 %v1490_v4 }
 0x8eb   :  { %v1483_v41 = vpop.xlane.xlu0 %1482 }
 0x8ec   :  { %v1493_v42 = vsub.f32 %v1477_v21, %v1483_v41 }
 0x8ee   :  { %v1497_v39 = vmul.f32 1.442695, %v1493_v42 }
 0x8ef   :  { %v1486_v43 = vpop.xlane.xlu1 %1485 }
 0x8f0   :  { %2305 = vpow2.f32 %v1497_v39  ;;  %v1494_v44 = vsub.f32 %v1478_v28, %v1486_v43  ;;  %v2250_v28 = vld [vmem:[#allocation14 + $0x30] sm:$0xff]  }
 0x8f2   :  { %v1499_v45 = vmul.f32 1.442695, %v1494_v44 }
 0x8f4   :  { %2307 = vpow2.f32 %v1499_v45 }
 0x8fa   :  { %v1489_v11 = vpop.xlane.xlu0 %1488 }
 0x8fb   :  { %v1495_v46 = vsub.f32 %v1479_v62, %v1489_v11 }
 0x8fd   :  { %v2306_v47 = vpop.eup %2305  ;;  %v1501_v49 = vmul.f32 1.442695, %v1495_v46 }
 0x8fe   :  { %v1492_v50 = vpop.xlane.xlu0 %1491  ;;  %v1505_v51 = vsel %vm627_vm2, %v2306_v47, 0.0 }
 0x8ff   :  { %2309 = vpow2.f32 %v1501_v49  ;;  %v1496_v18 = vsub.f32 %v1480_v40, %v1492_v50  ;;  %1506 = vadd.xlane.f32.xlu0 %v1505_v51  ;;  %v1935_v51 = vld [vmem:[%s2927_s10] ss:$0 sm:$0xff]  ;;  %s2540_s10 = smov [#allocation16]  }
 0x900   :  { %s1857_s28 = sshll.u32 %s2540_s10, 4  ;;  %s1858_s28 = int_to_ptr.vmem [resolvable:$true] %s1857_s28 }
 0x901   :  { %v2308_v52 = vpop.eup %2307  ;;  %v1503_v48 = vmul.f32 1.442695, %v1496_v18  ;;  %s2473_s29 = scalar_lea.vmem %s1858_s28, 1024  ;;  %p2478_p8 = scmp.lt.s32.totalorder %s1858_s28, %s1858_s28 }
 0x902   :  { %v1508_v54 = vsel %vm627_vm2, %v2308_v52, 0.0  ;;  %p2474_p7 = scmp.ne.s32.totalorder %s1858_s28, %s2473_s29  ;;  %p2479_p9 = scmp.lt.s32.totalorder %s2473_s29, %s2473_s29 }
 0x903   :  { %2311 = vpow2.f32 %v1503_v48  ;;  %1509 = vadd.xlane.f32.xlu1 %v1508_v54 }
 0x904   :  { %p2480_p10 = por %p2479_p9, %p2478_p8 }
 0x906   :  { %p2481_p11 = pnand %p2480_p10, %p2474_p7 }
 0x90c   :  { %v2310_v55 = vpop.eup %2309 }
 0x90d   :  { %v1511_v56 = vsel %vm627_vm2, %v2310_v55, 0.0 }
 0x90e   :  { %1512 = vadd.xlane.f32.xlu0 %v1511_v56 }
 0x910   :  { %v2312_v57 = vpop.eup %2311 }
 0x911   :  { %v1514_v59 = vsel %vm627_vm2, %v2312_v57, 0.0 }
 0x912   :  { %1515 = vadd.xlane.f32.xlu1 %v1514_v59 }
 0x923   :  { %1593 = vrot.lane.b32.xlu1 %v2710_v58, %s2539_s23 }
 0x924   :  { %1546 = vrot.lane.b32.xlu0 %v2712_v60, %s2539_s23 }
 0x927   :  { %1064 = vrot.lane.b32.xlu1 %v2796_v53, %s2539_s23 }
 0x928   :  { %1068 = vrot.lane.b32.xlu0 %v2804_v5, %s2539_s23 }
 0x92b   :  { %1066 = vrot.lane.b32.xlu1 %v2800_v63, %s2539_s23 }
 0x92c   :  { %1354 = vrot.lane.b32.xlu0 %v2850_v13, %s2529_s13 }
 0x92f   :  { %1070 = vrot.lane.b32.xlu1 %v2806_v7, %s2539_s23 }
 0x930   :  { %1358 = vrot.lane.b32.xlu0 %v1343_v26, %s2529_s13  ;;  %v2249_v26 = vld [vmem:[#allocation14 + $0x38] sm:$0xff]  }
 0x933   :  { %1356 = vrot.lane.b32.xlu1 %v2852_v15, %s2529_s13 }
 0x937   :  { %1360 = vrot.lane.b32.xlu1 %v1346_v30, %s2529_s13  ;;  %v2253_v30 = vld [vmem:[#allocation14 + $0x18] sm:$0xff]  }
 0x988   :  { %v1507_v58 = vpop.xlane.xlu0 %1506 }
 0x989   :  { %2313 = vrcp.f32 %v1507_v58 }
 0x98c   :  { %v1510_v60 = vpop.xlane.xlu1 %1509 }
 0x98d   :  { %2315 = vrcp.f32 %v1510_v60  ;;  %v2330_v60 = vld [vmem:[#allocation3 + $0x8] sm:$0xff] }
 0x996   :  { %v2314_v53 = vpop.eup %2313 }
 0x997   :  { %v1513_v5 = vpop.xlane.xlu0 %1512  ;;  %v1521_v63 = vmul.f32 %v2314_v53, %v2306_v47 }
 0x998   :  { %2317 = vrcp.f32 %v1513_v5  ;;  %v2331_v5 = vld [vmem:[#allocation3 + $0x10] sm:$0xff] }
 0x999   :  { %v1956_v61 = vpack.c.bf16 %v1521_v63, %v1521_v63 }
 0x99a   :  { %v2316_v0 = vpop.eup %2315 }
 0x99b   :  { %v1516_v1 = vpop.xlane.xlu1 %1515  ;;  %v1547_v2 = vpop.permute.xlu0 %1546  ;;  %v1522_v7 = vmul.f32 %v2316_v0, %v2308_v52  ;;  %1542 = vst.msk [vmem:[#allocation16 + $0x18] sm:$0xf] %vm688_vm3, %v1956_v61  ;;  %v2332_v61 = vld [vmem:[#allocation3 + $0x18] sm:$0xff] }
 0x99c   :  { %2319 = vrcp.f32 %v1516_v1  ;;  %2177 = vmatpush3.bf16.msra.mxu0 %v1547_v2 }
 0x99d   :  { %v1525_v3 = vpack.c.bf16 %v1522_v7, %v1521_v63  ;;  %v1957_v6 = vpack.c.bf16 %v1522_v7, %v1522_v7  ;;  %2188 = vmatprep.subr.bf16.mxu0 %v2249_v26 }
 0x99f   :  { %v1594_v8 = vpop.permute.xlu1 %1593  ;;  %1543 = vst.msk [vmem:[#allocation16 + $0x1c] sm:$0xf] %vm688_vm3, %v1957_v6  ;;  %2179 = vmatmul.mubr.msk.bf16.vlgmr.msra.gmra.mxu0 %vm627_vm2, %v1525_v3  ;;  %v1069_v9 = vpop.permute.xlu0 %1068 }
 0x9a0   :  { %1079 = vst.msk [vmem:[#allocation2 + $0x10] sm:$0xff] %vm1076_vm4, %v1069_v9  ;;  %2183 = vmatpush3.bf16.msra.mxu1 %v1594_v8  ;;  %2189 = vmatpush3.bf16.msra.mxu0 %v2249_v26 }
 0x9a1   :  { %2190 = vmatprep.subr.bf16.mxu0 %v2250_v28 }
 0x9a3   :  { %v1065_v10 = vpop.permute.xlu1 %1064  ;;  %v1355_v12 = vpop.permute.xlu0 %1354 }
 0x9a4   :  { %1077 = vst.msk [vmem:[#allocation2] sm:$0xff] %vm1076_vm4, %v1065_v10  ;;  %2191 = vmatpush3.bf16.msra.mxu0 %v2250_v28 }
 0x9a5   :  { %v2318_v13 = vpop.eup %2317  ;;  %1367 = vst.msk [vmem:[#allocation2] sm:$0xff] %vm1366_vm5, %v1355_v12  ;;  %2192 = vmatprep.subr.bf16.mxu0 %v2251_v27 }
 0x9a6   :  { %v1523_v14 = vmul.f32 %v2318_v13, %v2310_v55  ;;  %v2329_v55 = vld [vmem:[#allocation3] sm:$0xff] }
 0x9a7   :  { %v1067_v15 = vpop.permute.xlu1 %1066  ;;  %v1359_v16 = vpop.permute.xlu0 %1358 }
 0x9a8   :  { %1078 = vst.msk [vmem:[#allocation2 + $0x8] sm:$0xff] %vm1076_vm4, %v1067_v15  ;;  %v1958_v17 = vpack.c.bf16 %v1523_v14, %v1523_v14  ;;  %2193 = vmatpush3.bf16.msra.mxu0 %v2251_v27 }
 0x9a9   :  { %1369 = vst.msk [vmem:[#allocation2 + $0x10] sm:$0xff] %vm1366_vm5, %v1359_v16  ;;  %v2320_v19 = vpop.eup %2319  ;;  %2194 = vmatprep.subr.bf16.mxu0 %v2252_v29 }
 0x9aa   :  { %v1524_v20 = vmul.f32 %v2320_v19, %v2312_v57  ;;  %1544 = vst.msk [vmem:[#allocation16 + $0x38] sm:$0xf] %vm688_vm3, %v1958_v17 }
 0x9ab   :  { %v1071_v21 = vpop.permute.xlu1 %1070 }
 0x9ac   :  { %1080 = vst.msk [vmem:[#allocation2 + $0x18] sm:$0xff] %vm1076_vm4, %v1071_v21  ;;  %v1526_v22 = vpack.c.bf16 %v1524_v20, %v1523_v14  ;;  %v1959_v23 = vpack.c.bf16 %v1524_v20, %v1524_v20  ;;  %2195 = vmatpush3.bf16.msra.mxu0 %v2252_v29 }
 0x9ad   :  { %2196 = vmatprep.subr.bf16.mxu0 %v2253_v30 }
 0x9ae   :  { %1545 = vst.msk [vmem:[#allocation16 + $0x3c] sm:$0xf] %vm688_vm3, %v1959_v23  ;;  %2185 = vmatmul.mubr.msk.bf16.vlgmr.msra.gmra.mxu1 %vm627_vm2, %v1526_v22 }
 0x9af   :  { %v1357_v24 = vpop.permute.xlu1 %1356 }
 0x9b0   :  { %1368 = vst.msk [vmem:[#allocation2 + $0x8] sm:$0xff] %vm1366_vm5, %v1357_v24  ;;  %2197 = vmatpush3.bf16.msra.mxu0 %v2253_v30 }
 0x9b1   :  { %2198 = vmatprep.subr.bf16.mxu0 %v2254_v33 }
 0x9b3   :  { %v1361_v25 = vpop.permute.xlu1 %1360 }
 0x9b4   :  { %1370 = vst.msk [vmem:[#allocation2 + $0x18] sm:$0xff] %vm1366_vm5, %v1361_v25  ;;  %2199 = vmatpush3.bf16.msra.mxu0 %v2254_v33 }
 0x9b5   :  { %2200 = vmatprep.subr.bf16.mxu0 %v2255_v35 }
 0x9b8   :  { %2201 = vmatpush3.bf16.msra.mxu0 %v2255_v35 }
 0x9b9   :  { %2202 = vmatprep.subr.bf16.mxu0 %v2256_v36 }
 0x9bc   :  { %2203 = vmatpush3.bf16.msra.mxu0 %v2256_v36 }
 0xa5f   :  { %v1586_v31 = vpop.f32.mrf.mxu0 }
 0xa60   :  { %1644 = vrot.lane.b32.xlu0 %v1586_v31, %s2538_s8 }
 0xa61   :  { %v2180_v32 = vpop.f32.mrf.mxu0 }
 0xa63   :  { %v1589_v34 = vpop.f32.mrf.mxu0 }
 0xa64   :  { %1646 = vrot.lane.b32.xlu1 %v1589_v34, %s2538_s8 }
 0xa65   :  { %v2181_v62 = vpop.f32.mrf.mxu0 }
 0xa6e   :  { %v1633_v37 = vpop.f32.mrf.mxu1 }
 0xa6f   :  { %1648 = vrot.lane.b32.xlu0 %v1633_v37, %s2538_s8 }
 0xa70   :  { %v2186_v38 = vpop.f32.mrf.mxu1 }
 0xa72   :  { %v1636_v40 = vpop.f32.mrf.mxu1 }
 0xa73   :  { %1650 = vrot.lane.b32.xlu1 %v1636_v40, %s2538_s8 }
 0xa74   :  { %v2187_v4 = vpop.f32.mrf.mxu1 }
 0xad2   :  { %v1645_v41 = vpop.permute.xlu0 %1644 }
 0xad3   :  { %1657 = vst.msk [vmem:[#allocation2] sm:$0xff] %vm1656_vm6, %v1645_v41 }
 0xad6   :  { %v1647_v42 = vpop.permute.xlu1 %1646 }
 0xad7   :  { %1658 = vst.msk [vmem:[#allocation2 + $0x8] sm:$0xff] %vm1656_vm6, %v1647_v42 }
 0xada   :  { %v1661_v39 = vld [vmem:[#allocation2] sm:$0xff] }
 0xade   :  { %v1662_v43 = vld [vmem:[#allocation2 + $0x8] sm:$0xff] }
 0xadf   :  { %v1665_v44 = vpack.c.bf16 %v1662_v43, %v1661_v39 }
 0xae1   :  { %2204 = vmatprep.mubr.bf16.mxu0 %v1665_v44  ;;  %v1649_v45 = vpop.permute.xlu0 %1648 }
 0xae2   :  { %1659 = vst.msk [vmem:[#allocation2 + $0x10] sm:$0xff] %vm1656_vm6, %v1649_v45 }
 0xae5   :  { %v1651_v11 = vpop.permute.xlu1 %1650 }
 0xae6   :  { %1660 = vst.msk [vmem:[#allocation2 + $0x18] sm:$0xff] %vm1656_vm6, %v1651_v11 }
 0xae9   :  { %v1663_v46 = vld [vmem:[#allocation2 + $0x10] sm:$0xff] }
 0xaed   :  { %v1664_v47 = vld [vmem:[#allocation2 + $0x18] sm:$0xff] }
 0xaee   :  { %v1666_v49 = vpack.c.bf16 %v1664_v47, %v1663_v46 }
 0xaf0   :  { %2205 = vmatmul.mubr.bf16.vlgmr.msra.gmra.mxu0 %v1666_v49 }
 0xbb0   :  { %v2206_v50 = vpop.f32.mrf.mxu0 }
 0xbb1   :  { %v1781_v54 = vadd.f32 %v2206_v50, %v1935_v51 }
 0xbb2   :  { %v1772_v18 = vpop.f32.mrf.mxu0 }
 0xbb3   :  { %v1773_v52 = vadd.f32 %v1935_v51, %v1772_v18  ;;  %v1789_v63 = vadd.f32 %v2331_v5, %v1781_v54 }
 0xbb4   :  { %v2207_v48 = vpop.f32.mrf.mxu0 }
 0xbb5   :  { %v1787_v56 = vadd.f32 %v2329_v55, %v1773_v52  ;;  %v1784_v58 = vadd.f32 %v2207_v48, %v1935_v51 }
 0xbb6   :  { %v1775_v57 = vpop.f32.mrf.mxu0 }
 0xbb7   :  { %v1776_v59 = vadd.f32 %v1935_v51, %v1775_v57  ;;  %1791 = vadd.xlane.f32.xlu0 %v1787_v56  ;;  %v1790_v0 = vadd.f32 %v2332_v61, %v1784_v58 }
 0xbb9   :  { %v1788_v53 = vadd.f32 %v2330_v60, %v1776_v59 }
 0xbbb   :  { %1793 = vadd.xlane.f32.xlu1 %v1788_v53  ;;  %1795 = vadd.xlane.f32.xlu0 %v1789_v63 }
 0xbbf   :  { %1797 = vadd.xlane.f32.xlu0 %v1790_v0 }
 0xc40   :  { %v1792_v1 = vpop.xlane.xlu0 %1791 }
 0xc41   :  { %v1800_v2 = vmul.f32 0.0078125, %v1792_v1 }
 0xc43   :  { %v1804_v7 = vsub.f32 %v1787_v56, %v1800_v2 }
 0xc44   :  { %v1794_v3 = vpop.xlane.xlu1 %1793  ;;  %v1796_v6 = vpop.xlane.xlu0 %1795 }
 0xc45   :  { %v1801_v8 = vmul.f32 0.0078125, %v1794_v3  ;;  %v1802_v9 = vmul.f32 0.0078125, %v1796_v6  ;;  %v1808_v10 = vmul.f32 %v1804_v7, %v1804_v7 }
 0xc47   :  { %v1805_v12 = vsub.f32 %v1788_v53, %v1801_v8  ;;  %v1806_v13 = vsub.f32 %v1789_v63, %v1802_v9  ;;  %1812 = vadd.xlane.f32.xlu0 %v1808_v10 }
 0xc48   :  { %v1798_v14 = vpop.xlane.xlu0 %1797 }
 0xc49   :  { %v1803_v15 = vmul.f32 0.0078125, %v1798_v14  ;;  %v1809_v16 = vmul.f32 %v1805_v12, %v1805_v12  ;;  %v1810_v17 = vmul.f32 %v1806_v13, %v1806_v13 }
 0xc4b   :  { %v1807_v19 = vsub.f32 %v1790_v0, %v1803_v15  ;;  %1814 = vadd.xlane.f32.xlu1 %v1809_v16  ;;  %1816 = vadd.xlane.f32.xlu0 %v1810_v17 }
 0xc4d   :  { %v1811_v20 = vmul.f32 %v1807_v19, %v1807_v19 }
 0xc4f   :  { %1818 = vadd.xlane.f32.xlu1 %v1811_v20 }
 0xc50   :  { %2484 = shalt.err (!%p2481_p11)
}
 0xc51   :  { %1863 = dma.vmem_to_hbm [thread:$0]  %s1858_s28, 1024, %s2929_s12, [#allocation17], %s2529_s13, %s2529_s13, %s2530_s14  }
 0xc52   :  { %s2541_s12 = smov [#allocation15]  }
 0xc53   :  { %s1845_s13 = sshll.u32 %s2541_s12, 4  ;;  %s1846_s13 = int_to_ptr.vmem [resolvable:$true] %s1845_s13 }
 0xc54   :  { %s2493_s14 = scalar_lea.vmem %s1846_s13, 512  ;;  %p2498_p13 = scmp.lt.s32.totalorder %s1846_s13, %s1846_s13 }
 0xc55   :  { %p2494_p12 = scmp.ne.s32.totalorder %s1846_s13, %s2493_s14  ;;  %p2499_p0 = scmp.lt.s32.totalorder %s2493_s14, %s2493_s14 }
 0xc57   :  { %p2500_p1 = por %p2499_p0, %p2498_p13 }
 0xc59   :  { %p2501_p2 = pnand %p2500_p1, %p2494_p12 }
 0xcd0   :  { %v1813_v21 = vpop.xlane.xlu0 %1812 }
 0xcd1   :  { %v1820_v22 = vmul.f32 0.0078125, %v1813_v21 }
 0xcd3   :  { %v1824_v23 = vadd.f32 1e-05, %v1820_v22 }
 0xcd4   :  { %v1815_v24 = vpop.xlane.xlu1 %1814  ;;  %v1817_v25 = vpop.xlane.xlu0 %1816 }
 0xcd5   :  { %2321 = vrsqrt.f32 %v1824_v23  ;;  %v1821_v26 = vmul.f32 0.0078125, %v1815_v24  ;;  %v1822_v28 = vmul.f32 0.0078125, %v1817_v25 }
 0xcd7   :  { %v1825_v27 = vadd.f32 1e-05, %v1821_v26  ;;  %v1826_v29 = vadd.f32 1e-05, %v1822_v28 }
 0xcd8   :  { %v1819_v30 = vpop.xlane.xlu1 %1818 }
 0xcd9   :  { %2323 = vrsqrt.f32 %v1825_v27  ;;  %v1823_v31 = vmul.f32 0.0078125, %v1819_v30 }
 0xcda   :  { %2325 = vrsqrt.f32 %v1826_v29 }
 0xcdb   :  { %v1827_v32 = vadd.f32 1e-05, %v1823_v31 }
 0xcdd   :  { %2327 = vrsqrt.f32 %v1827_v32 }
 0xce2   :  { %v2322_v33 = vpop.eup %2321 }
 0xce3   :  { %v1832_v34 = vmul.f32 %v2322_v33, %v1804_v7 }
 0xce5   :  { %1836 = vst [vmem:[#allocation15] sm:$0xff] %v1832_v34 }
 0xce6   :  { %v2324_v62 = vpop.eup %2323 }
 0xce7   :  { %v2326_v35 = vpop.eup %2325  ;;  %v1833_v36 = vmul.f32 %v2324_v62, %v1805_v12 }
 0xce8   :  { %v1834_v37 = vmul.f32 %v2326_v35, %v1806_v13 }
 0xce9   :  { %1837 = vst [vmem:[#allocation15 + $0x8] sm:$0xff] %v1833_v36 }
 0xcea   :  { %v2328_v38 = vpop.eup %2327  ;;  %1838 = vst [vmem:[#allocation15 + $0x10] sm:$0xff] %v1834_v37 }
 0xceb   :  { %v1835_v40 = vmul.f32 %v2328_v38, %v1807_v19 }
 0xced   :  { %1839 = vst [vmem:[#allocation15 + $0x18] sm:$0xff] %v1835_v40 }
 0xcee   :  { %2504 = shalt.err (!%p2501_p2)
}
 0xcef   :  { %1851 = dma.vmem_to_hbm [thread:$0]  %s1846_s13, 512, %s2928_s11, [#allocation5], %s2527_s26, %s2527_s26, %s2528_s27  }
 0xcf0   :  { %2521 = dma.done.wait [#allocation5], 512  }
 0xcf1   :  { %2522 = vsyncadd [#allocation5], 4294966784 }
 0xcf2   :  { %2523 = dma.done.wait [#allocation17], 1024  }
 0xcf3   :  { %2524 = vsyncadd [#allocation17], 4294966272 }
 0xcf4   :  { %1870 = vsyncpa [#allocation4], 1 }
 0xcf5   :  { %1871 = vsyncpa [#allocation7], 1 }
 0xcf6   :  { %1872 = vsyncpa [#allocation10], 1 }
 0xcf7   :  { %1873 = vsyncpa [#allocation13], 1 }
 0xcf8   :  { %1874 = vsyncpa [#allocation5], 1 }
 0xcf9   :  { %1875 = vsyncpa [#allocation17], 1 }

</bundles_post_ra>
